<compile_context>
chip_gen: v6e
topology: v6e:2x2x1
jax: 0.10.0
libtpu: 0.0.40
codegen_flags: <defaults>
</compile_context>

<pallas_src>
import functools

import jax
import jax.numpy as jnp
from jax.experimental import pallas as pl
from jax.experimental.pallas import tpu as pltpu


def _round_up(x, m):
    return ((x + m - 1) // m) * m


# ----------------------------------------------------------------------------
# Fused kernel: graph -> Laplacian -> all Chebyshev GCN layers, per batch block
# ----------------------------------------------------------------------------
def _rgcnn_kernel(*refs, ks, fins, block_b, matmul_dtype, adj_exp_dtype):
    """refs = (x, W_0, b_0, ..., W_{L-1}, b_{L-1}, out)

    x   : (block_b, M, Fp0)        f32, vertex-major, features zero-padded to Fp0
    W_l : (K_l * Fp_l, Fout_l)     matmul_dtype (bf16), row index = k * Fp_l + fin
    b_l : (1, Fout_l)              f32
    out : (block_b, M, Fout_last)  f32, vertex-major (same layout as the module)
    """
    x_ref = refs[0]
    o_ref = refs[-1]
    wb_refs = refs[1:-1]
    M = x_ref.shape[1]
    Fp0 = x_ref.shape[2]

    # Static unroll over the batch block: on v5e/v6e the independent per-element
    # chains interleave in the MXU pipeline and hide the serial x@L dependency.
    for b in range(block_b):
        x_in = x_ref[b]                                         # (M, Fp0) f32
        xx = x_in * x_in

        # --- GetGraph: adj = exp(-(||x_i||^2 - 2<x_i,x_j> + ||x_j||^2)) ------
        inner = jax.lax.dot_general(                            # (M, M) = x x^T
            x_in, x_in, (((1,), (1,)), ((), ())),
            preferred_element_type=jnp.float32)
        sq_row = jnp.sum(xx, axis=1, keepdims=True)             # (M, 1)
        # (1, M) row of squared norms via a tiny MXU contraction; avoids any
        # sublane<->lane relayout / transpose of the column vector.
        sq_col = jax.lax.dot_general(
            jnp.ones((1, Fp0), jnp.float32), xx, (((1,), (1,)), ((), ())),
            preferred_element_type=jnp.float32)                 # (1, M)
        dist = sq_row - 2.0 * inner + sq_col                    # (M, M) f32
        # adj_exp_dtype=bf16 halves EUP transcendental time on v6e/v7x; the
        # default f32 matches the reference most closely (keep f32 on v5e).
        adj = jnp.exp(-dist.astype(adj_exp_dtype)).astype(jnp.float32)

        # --- GetLaplacian: L = I - D^{-1/2} adj D^{-1/2}, built in place -----
        d_row = jnp.sum(adj, axis=1, keepdims=True)             # (M, 1) row sums
        d_col = jnp.sum(adj, axis=0, keepdims=True)             # (1, M) ~ d_row^T (adj symmetric up to fp)
        s = adj * jax.lax.rsqrt(d_row) * jax.lax.rsqrt(d_col)   # normalized adjacency
        row = jax.lax.broadcasted_iota(jnp.int32, (M, M), 0)
        col = jax.lax.broadcasted_iota(jnp.int32, (M, M), 1)
        lap = jnp.where(row == col, 1.0 - s, -s).astype(matmul_dtype)  # (M, M) bf16

        # --- Chebyshev GCN layers, vertex-major: x_{k+1} = L @ x_k -----------
        # Per-order accumulation acc += T_k @ W_k on the bf16 MXU with f32
        # accumulation; recurrence state (x0/x1/x2) and acc stay f32.
        x_cur = x_in
        for li, (K, fp) in enumerate(zip(ks, fins)):
            w_ref = wb_refs[2 * li]                             # (K*fp, Fout) bf16
            bias_ref = wb_refs[2 * li + 1]                      # (1, Fout) f32

            def w_blk(k, _w_ref=w_ref, _fp=fp):
                # Static, sublane-aligned slice of the packed weight.
                return _w_ref[pl.ds(k * _fp, _fp), :]

            x0 = x_cur
            acc = jnp.dot(x0.astype(matmul_dtype), w_blk(0),
                          preferred_element_type=jnp.float32)   # (M, Fout) f32
            x1 = x0
            if K > 1:
                x1 = jnp.dot(lap, x0.astype(matmul_dtype),
                             preferred_element_type=jnp.float32)
                acc = acc + jnp.dot(x1.astype(matmul_dtype), w_blk(1),
                                    preferred_element_type=jnp.float32)
            for k in range(2, K):
                x2 = 2.0 * jnp.dot(lap, x1.astype(matmul_dtype),
                                   preferred_element_type=jnp.float32) - x0
                acc = acc + jnp.dot(x2.astype(matmul_dtype), w_blk(k),
                                    preferred_element_type=jnp.float32)
                x0, x1 = x1, x2

            x_cur = jnp.maximum(acc + bias_ref[...], 0.0)       # bias + ReLU

        o_ref[b] = x_cur                                        # (M, Fout_last)


# ----------------------------------------------------------------------------
# Host-side parameter packing (PyTorch layout -> kernel layout)
# ----------------------------------------------------------------------------
def pack_getfilter_params(W, B, K, Fin, *, fin_pad=None,
                          param_dtype=jnp.bfloat16):
    """Re-pack PyTorch-layout GetFilter params for the kernel.

    W : (K*Fin, Fout) with row index fin*K + k (the order produced by torch's
        permute(1,2,3,0).reshape(N*M, Fin*K)).
    B : (Fout,)
    Returns:
      W_packed : (K*fin_pad, Fout) param_dtype, row index k*fin_pad + fin,
                 zero rows for padded features.
      B_packed : (1, Fout) float32.
    """
    Fout = W.shape[1]
    if fin_pad is None:
        fin_pad = Fin
    W = jnp.asarray(W, jnp.float32).reshape(Fin, K, Fout)        # [fin, k, fout]
    W = jnp.transpose(W, (1, 0, 2))                              # [k, fin, fout]
    if fin_pad > Fin:
        W = jnp.pad(W, ((0, 0), (0, fin_pad - Fin), (0, 0)))
    W = W.reshape(K * fin_pad, Fout).astype(param_dtype)
    B = jnp.asarray(B, jnp.float32).reshape(1, Fout)
    return W, B


def _auto_config(n_batch):
    """Per-TPU-generation defaults for (block_b, vmem_limit_bytes)."""
    kind = ""
    try:
        kind = jax.devices()[0].device_kind.lower()
    except Exception:  # pragma: no cover
        pass
    if "v7" in kind:
        # 64 MiB VMEM: stay tight, megacore "parallel" grid shards the batch.
        want_bb, vmem = 1, 48 * 1024 * 1024
    elif "v5" in kind or "v6" in kind:
        # 128 MiB VMEM, single TC: interleave batch chains to hide x@L latency.
        want_bb, vmem = 2, 96 * 1024 * 1024
    else:
        want_bb, vmem = 1, 48 * 1024 * 1024
    block_b = 1
    for d in range(min(want_bb, max(n_batch, 1)), 0, -1):
        if n_batch % d == 0:
            block_b = d
            break
    return block_b, vmem


# ----------------------------------------------------------------------------
# Wrapper
# ----------------------------------------------------------------------------
def rgcnn_forward(x, weights, biases, ks, *, block_b=None,
                  matmul_dtype=jnp.bfloat16, vmem_limit_bytes=None,
                  adj_exp_dtype=jnp.float32):
    """x: (N, M, Fin0) -> (N, M, Fout_last), vertex-major float32.

    weights[l]: (K_l * Fp_l, Fout_l) kernel-packed (see pack_getfilter_params)
    biases[l] : (1, Fout_l) float32
    adj_exp_dtype: jnp.bfloat16 runs the M^2 adjacency exp on the bf16 EUP
        path (v6e/v7x only); default float32 stays closest to the reference.
    """
    N, M, Fin0 = x.shape
    num_layers = len(ks)
    assert len(weights) == num_layers and len(biases) == num_layers

    auto_bb, auto_vmem = _auto_config(N)
    if block_b is None:
        block_b = auto_bb
    if vmem_limit_bytes is None:
        vmem_limit_bytes = auto_vmem
    assert N % block_b == 0, "block_b must divide the batch size"

    ks = tuple(int(k) for k in ks)
    fins = tuple(int(w.shape[0]) // k for w, k in zip(weights, ks))
    Fp0 = fins[0]
    assert Fp0 >= Fin0
    for li in range(1, num_layers):
        assert fins[li] == int(weights[li - 1].shape[1]), "layer Fin/Fout mismatch"
    Fout_last = int(weights[-1].shape[1])

    x = jnp.asarray(x, jnp.float32)
    if Fp0 > Fin0:  # zero-pad features so first-layer tiles are sublane aligned
        x = jnp.pad(x, ((0, 0), (0, 0), (0, Fp0 - Fin0)))

    wb_args = []
    for w, bia in zip(weights, biases):
        wb_args.append(jnp.asarray(w, matmul_dtype))   # bf16 weights in HBM
        wb_args.append(jnp.asarray(bia, jnp.float32))
    args = [x] + wb_args

    kernel = functools.partial(
        _rgcnn_kernel, ks=ks, fins=fins, block_b=block_b,
        matmul_dtype=matmul_dtype, adj_exp_dtype=adj_exp_dtype)

    def call(single_buffer_weights):
        in_specs = [pl.BlockSpec((block_b, M, Fp0), lambda g: (g, 0, 0))]
        for arr in wb_args:
            if single_buffer_weights:
                # Block index is constant across the grid -> one buffer suffices.
                in_specs.append(pl.BlockSpec(arr.shape, lambda g: (0, 0),
                                             pipeline_mode=pl.Buffered(1)))
            else:
                in_specs.append(pl.BlockSpec(arr.shape, lambda g: (0, 0)))
        return pl.pallas_call(
            kernel,
            out_shape=jax.ShapeDtypeStruct((N, M, Fout_last), jnp.float32),
            grid=(N // block_b,),
            in_specs=in_specs,
            out_specs=pl.BlockSpec((block_b, M, Fout_last), lambda g: (g, 0, 0)),
            compiler_params=pltpu.CompilerParams(
                dimension_semantics=("parallel",),     # megacore batch sharding
                vmem_limit_bytes=vmem_limit_bytes),
        )(*args)

    if hasattr(pl, "Buffered"):
        try:
            return call(True)
        except Exception:  # build rejects buffer_count=1 -> default buffering
            pass
    return call(False)


# ----------------------------------------------------------------------------
# Pure-JAX reference (mirrors the PyTorch forward, f32) for validation
# ----------------------------------------------------------------------------
def rgcnn_reference(x, raw_params, ks):
    x = jnp.asarray(x, jnp.float32)
    N, M, _ = x.shape
    inner = jnp.einsum('nif,njf->nij', x, x)
    sq = jnp.sum(x * x, axis=2, keepdims=True)
    adj = jnp.exp(-(sq - 2.0 * inner + jnp.transpose(sq, (0, 2, 1))))
    d = jnp.sum(adj, axis=2)
    dinv = 1.0 / jnp.sqrt(d)
    lap = jnp.eye(M, dtype=jnp.float32)[None] - dinv[:, :, None] * adj * dinv[:, None, :]
    out = x
    for (W, B), K in zip(raw_params, ks):
        x0 = out
        parts = [x0]
        x1 = x0
        if K > 1:
            x1 = jnp.einsum('nij,njf->nif', lap, x0)
            parts.append(x1)
        for _ in range(2, K):
            x2 = 2.0 * jnp.einsum('nij,njf->nif', lap, x1) - x0
            parts.append(x2)
            x0, x1 = x1, x2
        stack = jnp.transpose(jnp.stack(parts, axis=0), (1, 2, 3, 0))  # (N,M,Fin,K)
        Fin = stack.shape[2]
        flat = stack.reshape(N * M, Fin * K)
        out = jax.nn.relu(flat @ W + B).reshape(N, M, -1)
    return out


# ----------------------------------------------------------------------------
# Model wrapper: deterministic init mirroring nn.init.normal_(std=0.2)
# ----------------------------------------------------------------------------
class RGCNNSegPallas:
    def __init__(self, vertice, F, K, M_fc, key, *, param_dtype=jnp.bfloat16):
        assert len(F) == len(K)
        self.vertice = vertice
        self.F, self.K, self.M_fc = list(F), list(K), list(M_fc)
        self.weights, self.biases, self.raw_params = [], [], []
        fin = 6  # first GetFilter layer uses Fin=6 (xyz + normals)
        for i, (f, k) in enumerate(zip(self.F, self.K)):
            key, wk, bk = jax.random.split(key, 3)
            # PyTorch layout: W (K*Fin, Fout), row index fin*K + k; B (Fout,)
            W = 0.2 * jax.random.normal(wk, (k * fin, f), jnp.float32)
            B = 0.2 * jax.random.normal(bk, (f,), jnp.float32)
            self.raw_params.append((W, B))
            fin_pad = _round_up(fin, 8) if i == 0 else fin
            Wp, Bp = pack_getfilter_params(W, B, k, fin, fin_pad=fin_pad,
                                           param_dtype=param_dtype)
            self.weights.append(Wp)   # bf16 in HBM: halves weight DMA + VMEM
            self.biases.append(Bp)
            fin = f
        # NOTE: the fc layers (M_fc) and the `cat` input are declared by the
        # reference module but never used by its forward(); not implemented.

    def __call__(self, x, cat=None, **kwargs):
        return rgcnn_forward(x, self.weights, self.biases, self.K, **kwargs)


if __name__ == "__main__":
    key = jax.random.PRNGKey(0)
    key, xkey = jax.random.split(key)

    N, vert = 2, 16
    x = jax.random.normal(xkey, (N, vert, 6), dtype=jnp.float32)  # (batch, vertices, xyz+normals)
    cat = jnp.zeros((N,), jnp.int32)                              # unused by the reference forward()

    model = RGCNNSegPallas(vertice=vert, F=[8, 16], K=[3, 3], M_fc=[50], key=key)
    y = model(x, cat)
    jax.block_until_ready(y)

    assert y.shape == (N, vert, 16)
    assert bool(jnp.all(jnp.isfinite(y)))

    # Validate the fused bf16 kernel against the f32 pure-JAX reference.
    y_ref = rgcnn_reference(x, model.raw_params, model.K)
    rel = float(jnp.linalg.norm(y - y_ref) / (jnp.linalg.norm(y_ref) + 1e-12))
    assert rel < 5e-2, f"relative error too large: {rel}"

    print("KERNEL_OK")
</pallas_src>

<mosaic_0001>
module attributes {stable_mosaic.version = 11 : i64} {
  func.func @_rgcnn_kernel(%arg0: i32, %arg1: memref<1x16x8xf32, #tpu.memory_space<vmem>>, %arg2: memref<24x8xbf16, #tpu.memory_space<vmem>>, %arg3: memref<1x8xf32, #tpu.memory_space<vmem>>, %arg4: memref<24x16xbf16, #tpu.memory_space<vmem>>, %arg5: memref<1x16xf32, #tpu.memory_space<vmem>>, %arg6: memref<1x16x16xf32, #tpu.memory_space<vmem>>) attributes {dimension_semantics = [#tpu.dimension_semantics<parallel>], iteration_bounds = array<i64: 2>, scalar_prefetch = 0 : i64, scratch_operands = 0 : i64, tpu.core_type = #tpu.core_type<tc>, window_params = [{transform_indices = @transform_0, window_bounds = array<i64: 1, 16, 8>}, {pipeline_mode = #tpu.pipeline_mode<synchronous>, transform_indices = @transform_1, window_bounds = array<i64: 24, 8>}, {pipeline_mode = #tpu.pipeline_mode<synchronous>, transform_indices = @transform_2, window_bounds = array<i64: 1, 8>}, {pipeline_mode = #tpu.pipeline_mode<synchronous>, transform_indices = @transform_3, window_bounds = array<i64: 24, 16>}, {pipeline_mode = #tpu.pipeline_mode<synchronous>, transform_indices = @transform_4, window_bounds = array<i64: 1, 16>}, {transform_indices = @transform_5, window_bounds = array<i64: 1, 16, 16>}]} {
    %c0 = arith.constant 0 : index
    %c0_0 = arith.constant 0 : index
    %c0_1 = arith.constant 0 : index
    %0 = vector.load %arg1[%c0, %c0_0, %c0_1] : memref<1x16x8xf32, #tpu.memory_space<vmem>>, vector<1x16x8xf32>
    %1 = vector.shape_cast %0 : vector<1x16x8xf32> to vector<16x8xf32>
    %2 = arith.mulf %1, %1 : vector<16x8xf32>
    %cst = arith.constant dense<0.000000e+00> : vector<16x16xf32>
    %3 = tpu.matmul %1, %1, %cst {dimension_numbers = #tpu.dot_dimension_numbers<[1], [1], [0], [0], [0, 0, 1, 0], [], []>} : vector<16x8xf32>, vector<16x8xf32>, vector<16x16xf32> -> vector<16x16xf32>
    %cst_2 = arith.constant dense<0.000000e+00> : vector<16xf32>
    %4 = vector.multi_reduction <add>, %2, %cst_2 [1] : vector<16x8xf32> to vector<16xf32>
    %5 = vector.shape_cast %4 : vector<16xf32> to vector<16x1xf32>
    %cst_3 = arith.constant 1.000000e+00 : f32
    %6 = vector.broadcast %cst_3 : f32 to vector<1x8xf32>
    %cst_4 = arith.constant dense<0.000000e+00> : vector<1x16xf32>
    %7 = tpu.matmul %6, %2, %cst_4 {dimension_numbers = #tpu.dot_dimension_numbers<[1], [1], [0], [0], [0, 0, 1, 0], [], []>} : vector<1x8xf32>, vector<16x8xf32>, vector<1x16xf32> -> vector<1x16xf32>
    %cst_5 = arith.constant 2.000000e+00 : f32
    %8 = vector.broadcast %cst_5 : f32 to vector<16x16xf32>
    %9 = arith.mulf %8, %3 : vector<16x16xf32>
    %10 = vector.broadcast %5 : vector<16x1xf32> to vector<16x16xf32>
    %11 = arith.subf %10, %9 : vector<16x16xf32>
    %12 = vector.broadcast %7 : vector<1x16xf32> to vector<16x16xf32>
    %13 = arith.addf %11, %12 : vector<16x16xf32>
    %cst_6 = arith.constant 0.000000e+00 : f32
    %14 = vector.broadcast %cst_6 : f32 to vector<16x16xf32>
    %15 = arith.subf %14, %13 : vector<16x16xf32>
    %16 = math.exp %15 : vector<16x16xf32>
    %cst_7 = arith.constant dense<0.000000e+00> : vector<16xf32>
    %17 = vector.multi_reduction <add>, %16, %cst_7 [1] : vector<16x16xf32> to vector<16xf32>
    %18 = vector.shape_cast %17 : vector<16xf32> to vector<16x1xf32>
    %cst_8 = arith.constant dense<0.000000e+00> : vector<16xf32>
    %19 = vector.multi_reduction <add>, %16, %cst_8 [0] : vector<16x16xf32> to vector<16xf32>
    %20 = vector.shape_cast %19 : vector<16xf32> to vector<1x16xf32>
    %21 = math.rsqrt %18 : vector<16x1xf32>
    %22 = vector.broadcast %21 : vector<16x1xf32> to vector<16x16xf32>
    %23 = arith.mulf %16, %22 : vector<16x16xf32>
    %24 = math.rsqrt %20 : vector<1x16xf32>
    %25 = vector.broadcast %24 : vector<1x16xf32> to vector<16x16xf32>
    %26 = arith.mulf %23, %25 : vector<16x16xf32>
    %27 = tpu.iota {dimensions = array<i32: 0>} : vector<16x16xi32>
    %28 = tpu.iota {dimensions = array<i32: 1>} : vector<16x16xi32>
    %29 = arith.cmpi eq, %27, %28 : vector<16x16xi32>
    %cst_9 = arith.constant 1.000000e+00 : f32
    %30 = vector.broadcast %cst_9 : f32 to vector<16x16xf32>
    %31 = arith.subf %30, %26 : vector<16x16xf32>
    %cst_10 = arith.constant 0.000000e+00 : f32
    %32 = vector.broadcast %cst_10 : f32 to vector<16x16xf32>
    %33 = arith.subf %32, %26 : vector<16x16xf32>
    %34 = arith.select %29, %31, %33 : vector<16x16xi1>, vector<16x16xf32>
    %35 = arith.truncf %34 : vector<16x16xf32> to vector<16x16xbf16>
    %36 = arith.truncf %1 : vector<16x8xf32> to vector<16x8xbf16>
    %c0_11 = arith.constant 0 : index
    %c0_12 = arith.constant 0 : index
    %37 = vector.load %arg2[%c0_11, %c0_12] : memref<24x8xbf16, #tpu.memory_space<vmem>>, vector<8x8xbf16>
    %cst_13 = arith.constant dense<0.000000e+00> : vector<16x8xf32>
    %38 = tpu.matmul %36, %37, %cst_13 {dimension_numbers = #tpu.dot_dimension_numbers<[1], [0], [0], [1], [0, 0, 1, 1], [], []>} : vector<16x8xbf16>, vector<8x8xbf16>, vector<16x8xf32> -> vector<16x8xf32>
    %39 = arith.truncf %1 : vector<16x8xf32> to vector<16x8xbf16>
    %cst_14 = arith.constant dense<0.000000e+00> : vector<16x8xf32>
    %40 = tpu.matmul %35, %39, %cst_14 {dimension_numbers = #tpu.dot_dimension_numbers<[1], [0], [0], [1], [0, 0, 1, 1], [], []>} : vector<16x16xbf16>, vector<16x8xbf16>, vector<16x8xf32> -> vector<16x8xf32>
    %41 = arith.truncf %40 : vector<16x8xf32> to vector<16x8xbf16>
    %c8 = arith.constant 8 : index
    %c0_15 = arith.constant 0 : index
    %42 = vector.load %arg2[%c8, %c0_15] : memref<24x8xbf16, #tpu.memory_space<vmem>>, vector<8x8xbf16>
    %cst_16 = arith.constant dense<0.000000e+00> : vector<16x8xf32>
    %43 = tpu.matmul %41, %42, %cst_16 {dimension_numbers = #tpu.dot_dimension_numbers<[1], [0], [0], [1], [0, 0, 1, 1], [], []>} : vector<16x8xbf16>, vector<8x8xbf16>, vector<16x8xf32> -> vector<16x8xf32>
    %44 = arith.addf %38, %43 : vector<16x8xf32>
    %45 = arith.truncf %40 : vector<16x8xf32> to vector<16x8xbf16>
    %cst_17 = arith.constant dense<0.000000e+00> : vector<16x8xf32>
    %46 = tpu.matmul %35, %45, %cst_17 {dimension_numbers = #tpu.dot_dimension_numbers<[1], [0], [0], [1], [0, 0, 1, 1], [], []>} : vector<16x16xbf16>, vector<16x8xbf16>, vector<16x8xf32> -> vector<16x8xf32>
    %cst_18 = arith.constant 2.000000e+00 : f32
    %47 = vector.broadcast %cst_18 : f32 to vector<16x8xf32>
    %48 = arith.mulf %47, %46 : vector<16x8xf32>
    %49 = arith.subf %48, %1 : vector<16x8xf32>
    %50 = arith.truncf %49 : vector<16x8xf32> to vector<16x8xbf16>
    %c16 = arith.constant 16 : index
    %c0_19 = arith.constant 0 : index
    %51 = vector.load %arg2[%c16, %c0_19] : memref<24x8xbf16, #tpu.memory_space<vmem>>, vector<8x8xbf16>
    %cst_20 = arith.constant dense<0.000000e+00> : vector<16x8xf32>
    %52 = tpu.matmul %50, %51, %cst_20 {dimension_numbers = #tpu.dot_dimension_numbers<[1], [0], [0], [1], [0, 0, 1, 1], [], []>} : vector<16x8xbf16>, vector<8x8xbf16>, vector<16x8xf32> -> vector<16x8xf32>
    %53 = arith.addf %44, %52 : vector<16x8xf32>
    %c0_21 = arith.constant 0 : index
    %c0_22 = arith.constant 0 : index
    %54 = vector.load %arg3[%c0_21, %c0_22] : memref<1x8xf32, #tpu.memory_space<vmem>>, vector<1x8xf32>
    %55 = vector.broadcast %54 : vector<1x8xf32> to vector<16x8xf32>
    %56 = arith.addf %53, %55 : vector<16x8xf32>
    %cst_23 = arith.constant 0.000000e+00 : f32
    %57 = vector.broadcast %cst_23 : f32 to vector<16x8xf32>
    %58 = arith.maximumf %56, %57 : vector<16x8xf32>
    %59 = arith.truncf %58 : vector<16x8xf32> to vector<16x8xbf16>
    %c0_24 = arith.constant 0 : index
    %c0_25 = arith.constant 0 : index
    %60 = vector.load %arg4[%c0_24, %c0_25] : memref<24x16xbf16, #tpu.memory_space<vmem>>, vector<8x16xbf16>
    %cst_26 = arith.constant dense<0.000000e+00> : vector<16x16xf32>
    %61 = tpu.matmul %59, %60, %cst_26 {dimension_numbers = #tpu.dot_dimension_numbers<[1], [0], [0], [1], [0, 0, 1, 1], [], []>} : vector<16x8xbf16>, vector<8x16xbf16>, vector<16x16xf32> -> vector<16x16xf32>
    %62 = arith.truncf %58 : vector<16x8xf32> to vector<16x8xbf16>
    %cst_27 = arith.constant dense<0.000000e+00> : vector<16x8xf32>
    %63 = tpu.matmul %35, %62, %cst_27 {dimension_numbers = #tpu.dot_dimension_numbers<[1], [0], [0], [1], [0, 0, 1, 1], [], []>} : vector<16x16xbf16>, vector<16x8xbf16>, vector<16x8xf32> -> vector<16x8xf32>
    %64 = arith.truncf %63 : vector<16x8xf32> to vector<16x8xbf16>
    %c8_28 = arith.constant 8 : index
    %c0_29 = arith.constant 0 : index
    %65 = vector.load %arg4[%c8_28, %c0_29] : memref<24x16xbf16, #tpu.memory_space<vmem>>, vector<8x16xbf16>
    %cst_30 = arith.constant dense<0.000000e+00> : vector<16x16xf32>
    %66 = tpu.matmul %64, %65, %cst_30 {dimension_numbers = #tpu.dot_dimension_numbers<[1], [0], [0], [1], [0, 0, 1, 1], [], []>} : vector<16x8xbf16>, vector<8x16xbf16>, vector<16x16xf32> -> vector<16x16xf32>
    %67 = arith.addf %61, %66 : vector<16x16xf32>
    %68 = arith.truncf %63 : vector<16x8xf32> to vector<16x8xbf16>
    %cst_31 = arith.constant dense<0.000000e+00> : vector<16x8xf32>
    %69 = tpu.matmul %35, %68, %cst_31 {dimension_numbers = #tpu.dot_dimension_numbers<[1], [0], [0], [1], [0, 0, 1, 1], [], []>} : vector<16x16xbf16>, vector<16x8xbf16>, vector<16x8xf32> -> vector<16x8xf32>
    %cst_32 = arith.constant 2.000000e+00 : f32
    %70 = vector.broadcast %cst_32 : f32 to vector<16x8xf32>
    %71 = arith.mulf %70, %69 : vector<16x8xf32>
    %72 = arith.subf %71, %58 : vector<16x8xf32>
    %73 = arith.truncf %72 : vector<16x8xf32> to vector<16x8xbf16>
    %c16_33 = arith.constant 16 : index
    %c0_34 = arith.constant 0 : index
    %74 = vector.load %arg4[%c16_33, %c0_34] : memref<24x16xbf16, #tpu.memory_space<vmem>>, vector<8x16xbf16>
    %cst_35 = arith.constant dense<0.000000e+00> : vector<16x16xf32>
    %75 = tpu.matmul %73, %74, %cst_35 {dimension_numbers = #tpu.dot_dimension_numbers<[1], [0], [0], [1], [0, 0, 1, 1], [], []>} : vector<16x8xbf16>, vector<8x16xbf16>, vector<16x16xf32> -> vector<16x16xf32>
    %76 = arith.addf %67, %75 : vector<16x16xf32>
    %c0_36 = arith.constant 0 : index
    %c0_37 = arith.constant 0 : index
    %77 = vector.load %arg5[%c0_36, %c0_37] : memref<1x16xf32, #tpu.memory_space<vmem>>, vector<1x16xf32>
    %78 = vector.broadcast %77 : vector<1x16xf32> to vector<16x16xf32>
    %79 = arith.addf %76, %78 : vector<16x16xf32>
    %cst_38 = arith.constant 0.000000e+00 : f32
    %80 = vector.broadcast %cst_38 : f32 to vector<16x16xf32>
    %81 = arith.maximumf %79, %80 : vector<16x16xf32>
    %c0_39 = arith.constant 0 : index
    %c0_40 = arith.constant 0 : index
    %c0_41 = arith.constant 0 : index
    %82 = vector.load %arg6[%c0_39, %c0_40, %c0_41] : memref<1x16x16xf32, #tpu.memory_space<vmem>>, vector<1x16x16xf32>
    %83 = vector.shape_cast %82 : vector<1x16x16xf32> to vector<16x16xf32>
    %84 = vector.shape_cast %81 : vector<16x16xf32> to vector<1x16x16xf32>
    tpu.vector_store %arg6[%c0_39, %c0_40, %c0_41], %84 {strides = array<i32>} : memref<1x16x16xf32, #tpu.memory_space<vmem>>, vector<1x16x16xf32>,
    return
  }
  func.func @transform_0(%arg0: i32) -> (i32, i32, i32) {
    %c0_i32 = arith.constant 0 : i32
    %c0_i32_0 = arith.constant 0 : i32
    %c0_i32_1 = arith.constant 0 : i32
    return %arg0, %c0_i32, %c0_i32_0 : i32, i32, i32
  }
  func.func @transform_1(%arg0: i32) -> (i32, i32) {
    %c0_i32 = arith.constant 0 : i32
    %c0_i32_0 = arith.constant 0 : i32
    %c0_i32_1 = arith.constant 0 : i32
    return %c0_i32, %c0_i32_0 : i32, i32
  }
  func.func @transform_2(%arg0: i32) -> (i32, i32) {
    %c0_i32 = arith.constant 0 : i32
    %c0_i32_0 = arith.constant 0 : i32
    %c0_i32_1 = arith.constant 0 : i32
    return %c0_i32, %c0_i32_0 : i32, i32
  }
  func.func @transform_3(%arg0: i32) -> (i32, i32) {
    %c0_i32 = arith.constant 0 : i32
    %c0_i32_0 = arith.constant 0 : i32
    %c0_i32_1 = arith.constant 0 : i32
    return %c0_i32, %c0_i32_0 : i32, i32
  }
  func.func @transform_4(%arg0: i32) -> (i32, i32) {
    %c0_i32 = arith.constant 0 : i32
    %c0_i32_0 = arith.constant 0 : i32
    %c0_i32_1 = arith.constant 0 : i32
    return %c0_i32, %c0_i32_0 : i32, i32
  }
  func.func @transform_5(%arg0: i32) -> (i32, i32, i32) {
    %c0_i32 = arith.constant 0 : i32
    %c0_i32_0 = arith.constant 0 : i32
    %c0_i32_1 = arith.constant 0 : i32
    return %arg0, %c0_i32, %c0_i32_0 : i32, i32, i32
  }
}

module attributes {stable_mosaic.version = 11 : i64} {
  func.func @_rgcnn_kernel(%arg0: i32, %arg1: memref<1x16x8xf32, #tpu.memory_space<vmem>>, %arg2: memref<24x8xbf16, #tpu.memory_space<vmem>>, %arg3: memref<1x8xf32, #tpu.memory_space<vmem>>, %arg4: memref<24x16xbf16, #tpu.memory_space<vmem>>, %arg5: memref<1x16xf32, #tpu.memory_space<vmem>>, %arg6: memref<1x16x16xf32, #tpu.memory_space<vmem>>) attributes {dimension_semantics = [#tpu.dimension_semantics<parallel>], iteration_bounds = array<i64: 2>, scalar_prefetch = 0 : i64, scratch_operands = 0 : i64, tpu.core_type = #tpu.core_type<tc>, window_params = [{transform_indices = @transform_0, window_bounds = array<i64: 1, 16, 8>}, {pipeline_mode = #tpu.pipeline_mode<synchronous>, transform_indices = @transform_1, window_bounds = array<i64: 24, 8>}, {pipeline_mode = #tpu.pipeline_mode<synchronous>, transform_indices = @transform_2, window_bounds = array<i64: 1, 8>}, {pipeline_mode = #tpu.pipeline_mode<synchronous>, transform_indices = @transform_3, window_bounds = array<i64: 24, 16>}, {pipeline_mode = #tpu.pipeline_mode<synchronous>, transform_indices = @transform_4, window_bounds = array<i64: 1, 16>}, {transform_indices = @transform_5, window_bounds = array<i64: 1, 16, 16>}]} {
    %c0 = arith.constant 0 : index
    %c0_0 = arith.constant 0 : index
    %c0_1 = arith.constant 0 : index
    %0 = vector.load %arg1[%c0, %c0_0, %c0_1] : memref<1x16x8xf32, #tpu.memory_space<vmem>>, vector<1x16x8xf32>
    %1 = vector.shape_cast %0 : vector<1x16x8xf32> to vector<16x8xf32>
    %2 = arith.mulf %1, %1 : vector<16x8xf32>
    %cst = arith.constant dense<0.000000e+00> : vector<16x16xf32>
    %3 = tpu.matmul %1, %1, %cst {dimension_numbers = #tpu.dot_dimension_numbers<[1], [1], [0], [0], [0, 0, 1, 0], [], []>} : vector<16x8xf32>, vector<16x8xf32>, vector<16x16xf32> -> vector<16x16xf32>
    %cst_2 = arith.constant dense<0.000000e+00> : vector<16xf32>
    %4 = vector.multi_reduction <add>, %2, %cst_2 [1] : vector<16x8xf32> to vector<16xf32>
    %5 = vector.shape_cast %4 : vector<16xf32> to vector<16x1xf32>
    %cst_3 = arith.constant 1.000000e+00 : f32
    %6 = vector.broadcast %cst_3 : f32 to vector<1x8xf32>
    %cst_4 = arith.constant dense<0.000000e+00> : vector<1x16xf32>
    %7 = tpu.matmul %6, %2, %cst_4 {dimension_numbers = #tpu.dot_dimension_numbers<[1], [1], [0], [0], [0, 0, 1, 0], [], []>} : vector<1x8xf32>, vector<16x8xf32>, vector<1x16xf32> -> vector<1x16xf32>
    %cst_5 = arith.constant 2.000000e+00 : f32
    %8 = vector.broadcast %cst_5 : f32 to vector<16x16xf32>
    %9 = arith.mulf %8, %3 : vector<16x16xf32>
    %10 = vector.broadcast %5 : vector<16x1xf32> to vector<16x16xf32>
    %11 = arith.subf %10, %9 : vector<16x16xf32>
    %12 = vector.broadcast %7 : vector<1x16xf32> to vector<16x16xf32>
    %13 = arith.addf %11, %12 : vector<16x16xf32>
    %cst_6 = arith.constant 0.000000e+00 : f32
    %14 = vector.broadcast %cst_6 : f32 to vector<16x16xf32>
    %15 = arith.subf %14, %13 : vector<16x16xf32>
    %16 = math.exp %15 : vector<16x16xf32>
    %cst_7 = arith.constant dense<0.000000e+00> : vector<16xf32>
    %17 = vector.multi_reduction <add>, %16, %cst_7 [1] : vector<16x16xf32> to vector<16xf32>
    %18 = vector.shape_cast %17 : vector<16xf32> to vector<16x1xf32>
    %cst_8 = arith.constant dense<0.000000e+00> : vector<16xf32>
    %19 = vector.multi_reduction <add>, %16, %cst_8 [0] : vector<16x16xf32> to vector<16xf32>
    %20 = vector.shape_cast %19 : vector<16xf32> to vector<1x16xf32>
    %21 = math.rsqrt %18 : vector<16x1xf32>
    %22 = vector.broadcast %21 : vector<16x1xf32> to vector<16x16xf32>
    %23 = arith.mulf %16, %22 : vector<16x16xf32>
    %24 = math.rsqrt %20 : vector<1x16xf32>
    %25 = vector.broadcast %24 : vector<1x16xf32> to vector<16x16xf32>
    %26 = arith.mulf %23, %25 : vector<16x16xf32>
    %27 = tpu.iota {dimensions = array<i32: 0>} : vector<16x16xi32>
    %28 = tpu.iota {dimensions = array<i32: 1>} : vector<16x16xi32>
    %29 = arith.cmpi eq, %27, %28 : vector<16x16xi32>
    %cst_9 = arith.constant 1.000000e+00 : f32
    %30 = vector.broadcast %cst_9 : f32 to vector<16x16xf32>
    %31 = arith.subf %30, %26 : vector<16x16xf32>
    %cst_10 = arith.constant 0.000000e+00 : f32
    %32 = vector.broadcast %cst_10 : f32 to vector<16x16xf32>
    %33 = arith.subf %32, %26 : vector<16x16xf32>
    %34 = arith.select %29, %31, %33 : vector<16x16xi1>, vector<16x16xf32>
    %35 = arith.truncf %34 : vector<16x16xf32> to vector<16x16xbf16>
    %36 = arith.truncf %1 : vector<16x8xf32> to vector<16x8xbf16>
    %c0_11 = arith.constant 0 : index
    %c0_12 = arith.constant 0 : index
    %37 = vector.load %arg2[%c0_11, %c0_12] : memref<24x8xbf16, #tpu.memory_space<vmem>>, vector<8x8xbf16>
    %cst_13 = arith.constant dense<0.000000e+00> : vector<16x8xf32>
    %38 = tpu.matmul %36, %37, %cst_13 {dimension_numbers = #tpu.dot_dimension_numbers<[1], [0], [0], [1], [0, 0, 1, 1], [], []>} : vector<16x8xbf16>, vector<8x8xbf16>, vector<16x8xf32> -> vector<16x8xf32>
    %39 = arith.truncf %1 : vector<16x8xf32> to vector<16x8xbf16>
    %cst_14 = arith.constant dense<0.000000e+00> : vector<16x8xf32>
    %40 = tpu.matmul %35, %39, %cst_14 {dimension_numbers = #tpu.dot_dimension_numbers<[1], [0], [0], [1], [0, 0, 1, 1], [], []>} : vector<16x16xbf16>, vector<16x8xbf16>, vector<16x8xf32> -> vector<16x8xf32>
    %41 = arith.truncf %40 : vector<16x8xf32> to vector<16x8xbf16>
    %c8 = arith.constant 8 : index
    %c0_15 = arith.constant 0 : index
    %42 = vector.load %arg2[%c8, %c0_15] : memref<24x8xbf16, #tpu.memory_space<vmem>>, vector<8x8xbf16>
    %cst_16 = arith.constant dense<0.000000e+00> : vector<16x8xf32>
    %43 = tpu.matmul %41, %42, %cst_16 {dimension_numbers = #tpu.dot_dimension_numbers<[1], [0], [0], [1], [0, 0, 1, 1], [], []>} : vector<16x8xbf16>, vector<8x8xbf16>, vector<16x8xf32> -> vector<16x8xf32>
    %44 = arith.addf %38, %43 : vector<16x8xf32>
    %45 = arith.truncf %40 : vector<16x8xf32> to vector<16x8xbf16>
    %cst_17 = arith.constant dense<0.000000e+00> : vector<16x8xf32>
    %46 = tpu.matmul %35, %45, %cst_17 {dimension_numbers = #tpu.dot_dimension_numbers<[1], [0], [0], [1], [0, 0, 1, 1], [], []>} : vector<16x16xbf16>, vector<16x8xbf16>, vector<16x8xf32> -> vector<16x8xf32>
    %cst_18 = arith.constant 2.000000e+00 : f32
    %47 = vector.broadcast %cst_18 : f32 to vector<16x8xf32>
    %48 = arith.mulf %47, %46 : vector<16x8xf32>
    %49 = arith.subf %48, %1 : vector<16x8xf32>
    %50 = arith.truncf %49 : vector<16x8xf32> to vector<16x8xbf16>
    %c16 = arith.constant 16 : index
    %c0_19 = arith.constant 0 : index
    %51 = vector.load %arg2[%c16, %c0_19] : memref<24x8xbf16, #tpu.memory_space<vmem>>, vector<8x8xbf16>
    %cst_20 = arith.constant dense<0.000000e+00> : vector<16x8xf32>
    %52 = tpu.matmul %50, %51, %cst_20 {dimension_numbers = #tpu.dot_dimension_numbers<[1], [0], [0], [1], [0, 0, 1, 1], [], []>} : vector<16x8xbf16>, vector<8x8xbf16>, vector<16x8xf32> -> vector<16x8xf32>
    %53 = arith.addf %44, %52 : vector<16x8xf32>
    %c0_21 = arith.constant 0 : index
    %c0_22 = arith.constant 0 : index
    %54 = vector.load %arg3[%c0_21, %c0_22] : memref<1x8xf32, #tpu.memory_space<vmem>>, vector<1x8xf32>
    %55 = vector.broadcast %54 : vector<1x8xf32> to vector<16x8xf32>
    %56 = arith.addf %53, %55 : vector<16x8xf32>
    %cst_23 = arith.constant 0.000000e+00 : f32
    %57 = vector.broadcast %cst_23 : f32 to vector<16x8xf32>
    %58 = arith.maximumf %56, %57 : vector<16x8xf32>
    %59 = arith.truncf %58 : vector<16x8xf32> to vector<16x8xbf16>
    %c0_24 = arith.constant 0 : index
    %c0_25 = arith.constant 0 : index
    %60 = vector.load %arg4[%c0_24, %c0_25] : memref<24x16xbf16, #tpu.memory_space<vmem>>, vector<8x16xbf16>
    %cst_26 = arith.constant dense<0.000000e+00> : vector<16x16xf32>
    %61 = tpu.matmul %59, %60, %cst_26 {dimension_numbers = #tpu.dot_dimension_numbers<[1], [0], [0], [1], [0, 0, 1, 1], [], []>} : vector<16x8xbf16>, vector<8x16xbf16>, vector<16x16xf32> -> vector<16x16xf32>
    %62 = arith.truncf %58 : vector<16x8xf32> to vector<16x8xbf16>
    %cst_27 = arith.constant dense<0.000000e+00> : vector<16x8xf32>
    %63 = tpu.matmul %35, %62, %cst_27 {dimension_numbers = #tpu.dot_dimension_numbers<[1], [0], [0], [1], [0, 0, 1, 1], [], []>} : vector<16x16xbf16>, vector<16x8xbf16>, vector<16x8xf32> -> vector<16x8xf32>
    %64 = arith.truncf %63 : vector<16x8xf32> to vector<16x8xbf16>
    %c8_28 = arith.constant 8 : index
    %c0_29 = arith.constant 0 : index
    %65 = vector.load %arg4[%c8_28, %c0_29] : memref<24x16xbf16, #tpu.memory_space<vmem>>, vector<8x16xbf16>
    %cst_30 = arith.constant dense<0.000000e+00> : vector<16x16xf32>
    %66 = tpu.matmul %64, %65, %cst_30 {dimension_numbers = #tpu.dot_dimension_numbers<[1], [0], [0], [1], [0, 0, 1, 1], [], []>} : vector<16x8xbf16>, vector<8x16xbf16>, vector<16x16xf32> -> vector<16x16xf32>
    %67 = arith.addf %61, %66 : vector<16x16xf32>
    %68 = arith.truncf %63 : vector<16x8xf32> to vector<16x8xbf16>
    %cst_31 = arith.constant dense<0.000000e+00> : vector<16x8xf32>
    %69 = tpu.matmul %35, %68, %cst_31 {dimension_numbers = #tpu.dot_dimension_numbers<[1], [0], [0], [1], [0, 0, 1, 1], [], []>} : vector<16x16xbf16>, vector<16x8xbf16>, vector<16x8xf32> -> vector<16x8xf32>
    %cst_32 = arith.constant 2.000000e+00 : f32
    %70 = vector.broadcast %cst_32 : f32 to vector<16x8xf32>
    %71 = arith.mulf %70, %69 : vector<16x8xf32>
    %72 = arith.subf %71, %58 : vector<16x8xf32>
    %73 = arith.truncf %72 : vector<16x8xf32> to vector<16x8xbf16>
    %c16_33 = arith.constant 16 : index
    %c0_34 = arith.constant 0 : index
    %74 = vector.load %arg4[%c16_33, %c0_34] : memref<24x16xbf16, #tpu.memory_space<vmem>>, vector<8x16xbf16>
    %cst_35 = arith.constant dense<0.000000e+00> : vector<16x16xf32>
    %75 = tpu.matmul %73, %74, %cst_35 {dimension_numbers = #tpu.dot_dimension_numbers<[1], [0], [0], [1], [0, 0, 1, 1], [], []>} : vector<16x8xbf16>, vector<8x16xbf16>, vector<16x16xf32> -> vector<16x16xf32>
    %76 = arith.addf %67, %75 : vector<16x16xf32>
    %c0_36 = arith.constant 0 : index
    %c0_37 = arith.constant 0 : index
    %77 = vector.load %arg5[%c0_36, %c0_37] : memref<1x16xf32, #tpu.memory_space<vmem>>, vector<1x16xf32>
    %78 = vector.broadcast %77 : vector<1x16xf32> to vector<16x16xf32>
    %79 = arith.addf %76, %78 : vector<16x16xf32>
    %cst_38 = arith.constant 0.000000e+00 : f32
    %80 = vector.broadcast %cst_38 : f32 to vector<16x16xf32>
    %81 = arith.maximumf %79, %80 : vector<16x16xf32>
    %c0_39 = arith.constant 0 : index
    %c0_40 = arith.constant 0 : index
    %c0_41 = arith.constant 0 : index
    %82 = vector.load %arg6[%c0_39, %c0_40, %c0_41] : memref<1x16x16xf32, #tpu.memory_space<vmem>>, vector<1x16x16xf32>
    %83 = vector.shape_cast %82 : vector<1x16x16xf32> to vector<16x16xf32>
    %84 = vector.shape_cast %81 : vector<16x16xf32> to vector<1x16x16xf32>
    tpu.vector_store %arg6[%c0_39, %c0_40, %c0_41], %84 {strides = array<i32>} : memref<1x16x16xf32, #tpu.memory_space<vmem>>, vector<1x16x16xf32>,
    return
  }
  func.func @transform_0(%arg0: i32) -> (i32, i32, i32) {
    %c0_i32 = arith.constant 0 : i32
    %c0_i32_0 = arith.constant 0 : i32
    %c0_i32_1 = arith.constant 0 : i32
    return %arg0, %c0_i32, %c0_i32_0 : i32, i32, i32
  }
  func.func @transform_1(%arg0: i32) -> (i32, i32) {
    %c0_i32 = arith.constant 0 : i32
    %c0_i32_0 = arith.constant 0 : i32
    %c0_i32_1 = arith.constant 0 : i32
    return %c0_i32, %c0_i32_0 : i32, i32
  }
  func.func @transform_2(%arg0: i32) -> (i32, i32) {
    %c0_i32 = arith.constant 0 : i32
    %c0_i32_0 = arith.constant 0 : i32
    %c0_i32_1 = arith.constant 0 : i32
    return %c0_i32, %c0_i32_0 : i32, i32
  }
  func.func @transform_3(%arg0: i32) -> (i32, i32) {
    %c0_i32 = arith.constant 0 : i32
    %c0_i32_0 = arith.constant 0 : i32
    %c0_i32_1 = arith.constant 0 : i32
    return %c0_i32, %c0_i32_0 : i32, i32
  }
  func.func @transform_4(%arg0: i32) -> (i32, i32) {
    %c0_i32 = arith.constant 0 : i32
    %c0_i32_0 = arith.constant 0 : i32
    %c0_i32_1 = arith.constant 0 : i32
    return %c0_i32, %c0_i32_0 : i32, i32
  }
  func.func @transform_5(%arg0: i32) -> (i32, i32, i32) {
    %c0_i32 = arith.constant 0 : i32
    %c0_i32_0 = arith.constant 0 : i32
    %c0_i32_1 = arith.constant 0 : i32
    return %arg0, %c0_i32, %c0_i32_0 : i32, i32, i32
  }
}

</mosaic_0001>

<bundles_post_ra>
// kernel: tpu_custom_call.1
= control target key start
LH: loop header
LB: loop body
LE: loop exit
PB: predicated region body
PF: predicated region fallthrough
CT: control target
= control target key end

     0   :  { %10 = vsyncpa [#allocation3], 0  ;;  %s1523_s0 = inlined_call_operand.vmem [shape: f32[2,16,8], index: 0, kind: input, shape index: {}]   ;;  %s1524_s1 = inlined_call_operand.vmem [shape: bf16[24,8], index: 1, kind: input, shape index: {}]   ;;  %s1525_s2 = inlined_call_operand.vmem [shape: f32[1,8], index: 2, kind: input, shape index: {}]   ;;  %s1526_s3 = inlined_call_operand.vmem [shape: bf16[24,16], index: 3, kind: input, shape index: {}]   ;;  %s1527_s4 = inlined_call_operand.vmem [shape: f32[1,16], index: 4, kind: input, shape index: {}]   ;;  %s1528_s5 = inlined_call_operand.hbm [shape: f32[2,16,16], index: 5, kind: output, shape index: {}]  }
   0x1   :  { %12 = vsyncpa [#allocation3 + $0x1], 0  ;;  %s1306_s18 = smov 0   ;;  %s1308_s19 = smov 0  }
   0x2   :  { %s1310_s20 = smov 0   ;;  %s1312_s21 = smov 0  }
   0x3 LB: > { %s1327_s22 = sadd.s32 4294967295, %s1268_s21   ;;  %s1020_s23 = sadd.s32 4294967294, %s1268_s21   ;;  %s1268_s21 = sphi %s1312_s21, %s1534_s21   ;;  %s1264_s20 = sphi %s1310_s20, %s1533_s20   ;;  %s1260_s19 = sphi %s1308_s19, %s1532_s19   ;;  %s1256_s18 = sphi %s1306_s18, %s1531_s18  }
   0x4   : > { %s1331_s24 = sadd.s32 1, %s1268_s21   ;;  %s135_s25 = sadd.s32 1, %s1264_s20 }
   0x5   : > { %s132_s26 = ssub.s32 %s1268_s21, %s1331_s24  ;;  %p145_p0 = scmp.ne.s32.totalorder %s1264_s20, %s1260_s19 }
   0x6   : > { %p133_p1 = scmp.eq.s32.totalorder %s132_s26, 0  ;;  %p146_p2 = scmp.eq.s32.totalorder %s1327_s22, 1 }
   0x7   : > { %p151_p3 = scmp.ne.s32.totalorder %s1260_s19, %s1256_s18  ;;  %p152_p4 = scmp.eq.s32.totalorder %s1020_s23, 1 }
   0x8   : > { %s1342_s27 = scalar_select %p133_p1, %s1264_s20, %s135_s25  }
   0x9   : > { %p1344_p5 = por %p146_p2, %p145_p0  ;;  %p1348_p6 = por %p152_p4, %p151_p3 }
   0xa   : > { %p1023_p7 = scmp.ge.s32.totalorder %s1268_s21, 1  ;;  %p190_p8 = scmp.lt.s32.totalorder %s1268_s21, 3 }
   0xc   : > { %p191_p9 = pnand %p1023_p7, %p190_p8 }
   0xd   : > { %p218_p10 = scmp.lt.s32.totalorder (!%p191_p9), %s1327_s22, 1  ;;  %s215_s8 = sand.u32 (!%p191_p9), 1, %s1260_s19  }
   0xe   : > { %194 = sbr.rel (%p191_p9) target bundleno = 1662 (0x67e), region = 40  ;;  %s1024_s11 = sshll.u32 (!%p191_p9), %s215_s8, 4 }
   0xf   : > { %s1052_s12 = sshll.u32 (!%p191_p9), %s1327_s22, 8  ;;  %s217_s13 = scalar_lea.vmem (!%p191_p9), [#allocation2], %s1024_s11 }
  0x10   : > { %s958_s14 = sshll.u32 (!%p191_p9), %s217_s13, 4  ;;  %s1478_s17 = scalar_lea.hbm (!%p191_p9), %s1528_s5, %s1052_s12  ;;  %s1480_s14 = int_to_ptr.vmem [resolvable:$true] %s958_s14 }
  0x11   : > { %s1208_s23 = scalar_lea.vmem (!%p191_p9), %s1480_s14, 256  ;;  %s1273_s25 = smov (!%p191_p9), [#allocation2]  }
  0x12   : > { %p1209_p11 = scmp.ne.s32.totalorder (!%p191_p9), %s1480_s14, %s1208_s23  ;;  %s1212_s26 = sshll.u32 (!%p191_p9), %s1273_s25, 4  ;;  %s1213_s26 = int_to_ptr.vmem [resolvable:$false] %s1212_s26 }
  0x13   : > { %v1270_v0 = vmov 0.0   ;;  %vm1271_vm0 = vmmov 0   ;;  %s219_s30 = scalar_select %p218_p10, %s1327_s22, 1  ;;  %vm228_vm1 = vcmask 64512   ;;  %v1272_v7 = vmov 1.0  }
  0x14   : > { %1087 = vmatprep.subr.mxu1 %v1270_v0  ;;  %1091 = vmatprep.mubr.msk.f32.mxu1 %vm1271_vm0, %v1270_v0  ;;  %v399_v8 = vlaneseq  ;;  %vm411_vm4 = vcmask 130048   ;;  %v493_v58 = vld [vmem:[%s1524_s1 + $0x4] sm:$0xf]  ;;  %vm497_vm5 = vcmask 1043456   ;;  %v447_v60 = vld [vmem:[%s1524_s1] sm:$0xf]  ;;  %p1210_p12 = pnand %p1209_p11, %p1344_p5  ;;  %p1215_p0 = scmp.lt.s32.totalorder %s1480_s14, %s1213_s26 }
  0x15   : > { %s1051_s6 = sshll.u32 %s219_s30, 4  ;;  %v499_v59 = vsel %vm497_vm5, %v493_v58, 0  ;;  %v546_v61 = vsel %vm497_vm5, %v447_v60, 0  ;;  %s1483_s22 = scalar_lea.sflag [#allocation3], %s215_s8 }
  0x16   : > { %s222_s9 = scalar_lea.vmem %s1523_s0, %s1051_s6  ;;  %v400_v9 = vshrl.u32 %v399_v8, 7  ;;  %v436_v11 = vand.u32 127, %v399_v8  ;;  %p1211_p13 = pneg %p1210_p12 }
  0x17   : > { %v1362_v1 = vld [vmem:[%s222_s9 + $0x8] sm:$0xff]  ;;  %v1364_v2 = vld [vmem:[%s222_s9] sm:$0xff]  ;;  %s1214_s30 = scalar_lea.vmem %s1213_s26, 512 }
  0x18   : > { %1080 = vmatprep.subr.msk.mxu0 %vm228_vm1, %v1362_v1  ;;  %v227_v3 = vmul.f32 %v1362_v1, %v1362_v1  ;;  %1084 = vmatprep.mubr.msk.f32.mxu0 %vm228_vm1, %v1364_v2  ;;  %v226_v4 = vmul.f32 %v1364_v2, %v1364_v2  ;;  %v434_v10 = vadd.s32 8, %v400_v9  ;;  %vm437_vm2 = vcmp.eq.s32.totalorder %v400_v9, %v436_v11  ;;  %p1216_p1 = scmp.lt.s32.totalorder %s1214_s30, %s1208_s23 }
  0x19   : > { %1081 = vmatpush3.xpose.msk.msra.mxu0 %vm228_vm1, %v1362_v1  ;;  %v401_v13 = vsub.s32 0, %v400_v9  ;;  %v446_v35 = vpack.c.bf16 %v1362_v1, %v1364_v2 }
  0x1a   : > { %1088 = vmatpush3.xpose.msk.msra.mxu1 %vm228_vm1, %v227_v3  ;;  %1082 = vmatprep.subr.msk.mxu0 %vm228_vm1, %v1364_v2  ;;  %v310_v5 = vsel %vm228_vm1, %v226_v4, 0.0  ;;  %v313_v6 = vsel %vm228_vm1, %v227_v3, 0.0  ;;  %vm438_vm3 = vcmp.eq.s32.totalorder %v434_v10, %v436_v11  ;;  %v635_v10 = vld [vmem:[%s1524_s1 + $0x8] sm:$0xf]  ;;  %p1217_p2 = por %p1216_p1, %p1215_p0 }
  0x1b   : > { %1089 = vmatprep.subr.mxu1 %v1270_v0  ;;  %311 = vadd.xlane.f32.xlu0 %v310_v5  ;;  %v640_v11 = vsel %vm497_vm5, %v635_v10, 0 }
  0x1c   : > { %p1218_p3 = pnand %p1217_p2, %p1211_p13 }
  0x1d   : > { %1083 = vmatpush3.xpose.msk.msra.mxu0 %vm228_vm1, %v1364_v2 }
  0x1e   : > { %1090 = vmatpush3.xpose.msk.msra.mxu1 %vm228_vm1, %v226_v4  ;;  %1094 = vmatprep.subr.bf16.mxu0 %v1270_v0 }
  0x1f   : > { %314 = vadd.xlane.f32.xlu0 %v313_v6  ;;  %1100 = vmatprep.subr.bf16.mxu1 %v1270_v0 }
  0x20   : > { %1085 = vmatmul.mubr.msk.f32.vlgmr.msra.gmra.mxu0 %vm228_vm1, %v1362_v1 }
  0x21   : > { %1092 = vmatmul.mubr.msk.f32.vlgmr.msra.gmra.mxu1 %vm228_vm1, %v1272_v7  ;;  %1096 = vmatprep.mubr.msk.bf16.mxu0 %vm1271_vm0, %v1270_v0 }
  0x22   : > { %1102 = vmatprep.mubr.msk.bf16.mxu1 %vm1271_vm0, %v1270_v0  ;;  %1095 = vmatpush3.bf16.msra.mxu0 %v446_v35 }
  0x23   : > { %1106 = vmatprep.subr.bf16.mxu0 %v1270_v0  ;;  %1101 = vmatpush3.bf16.msra.mxu1 %v499_v59 }
  0x24   : > { %1112 = vmatprep.subr.bf16.mxu1 %v1270_v0 }
  0xa4   : > { %v312_v12 = vpop.xlane.xlu0 %311 }
  0xa8   : > { %v315_v15 = vpop.xlane.xlu0 %314 }
  0xe0   : > { %v1086_v14 = vpop.f32.mrf.mxu0 }
  0xe1   : > { %v396_v16 = vmul.f32 2.0, %v1086_v14  ;;  %v391_v17 = vpop.f32.mrf.mxu1 }
  0xe2   : > { %v301_v18 = vpop.f32.mrf.mxu0  ;;  %v402_v19 = vrot.slane %v391_v17, %v401_v13 }
  0xe3   : > { %v395_v20 = vmul.f32 2.0, %v301_v18  ;;  %v398_v21 = vsub.f32 %v315_v15, %v396_v16  ;;  %v1093_v22 = vpop.f32.mrf.mxu1 }
  0xe5   : > { %v397_v23 = vsub.f32 %v312_v12, %v395_v20  ;;  %v404_v24 = vadd.f32 %v402_v19, %v398_v21 }
  0xe7   : > { %v403_v25 = vadd.f32 %v402_v19, %v397_v23  ;;  %v406_v26 = vsub.f32 0.0, %v404_v24 }
  0xe9   : > { %v405_v27 = vsub.f32 0.0, %v403_v25  ;;  %v409_v28 = vmul.f32 1.442695, %v406_v26 }
  0xeb   : > { %v407_v29 = vmul.f32 1.442695, %v405_v27  ;;  %1198 = vpow2.f32 %v409_v28  ;;  %v1039_v28 = vld [vmem:[%s1525_s2] ss:$0 sm:$0xff] }
  0xed   : > { %1200 = vpow2.f32 %v407_v29 }
  0xf8   : > { %v1199_v30 = vpop.eup %1198 }
  0xf9   : > { %v415_v33 = vsel %vm411_vm4, %v1199_v30, 0.0 }
  0xfa   : > { %v1201_v31 = vpop.eup %1200 }
  0xfb   : > { %v412_v32 = vsel %vm411_vm4, %v1201_v31, 0.0 }
  0xfc   : > { %413 = vadd.xlane.f32.xlu1 %v412_v32  ;;  %v418_v34 = vadd.f32 %v415_v33, %v412_v32 }
  0xfe   : > { %v419_v36 = vrot.slane %v418_v34, 4 }
 0x100   : > { %416 = vadd.xlane.f32.xlu1 %v415_v33  ;;  %v420_v37 = vadd.f32 %v419_v36, %v418_v34 }
 0x102   : > { %v421_v38 = vrot.slane %v420_v37, 2 }
 0x104   : > { %v422_v39 = vadd.f32 %v421_v38, %v420_v37  ;;  %v697_v37 = vld [vmem:[%s1526_s3] sm:$0xf] }
 0x105   : > { %v792_v38 = vsel %vm497_vm5, %v697_v37, 0 }
 0x106   : > { %v423_v40 = vrot.slane %v422_v39, 1 }
 0x108   : > { %v424_v41 = vadd.f32 %v423_v40, %v422_v39  ;;  %v740_v39 = vld [vmem:[%s1526_s3 + $0x4] sm:$0xf] }
 0x109   : > { %v745_v40 = vsel %vm497_vm5, %v740_v39, 0 }
 0x185   : > { %v414_v42 = vpop.xlane.xlu1 %413 }
 0x186   : > { %1202 = vrsqrt.f32 %v414_v42 }
 0x187   : > { %1204 = vrsqrt.f32 %v424_v41 }
 0x189   : > { %v417_v43 = vpop.xlane.xlu1 %416 }
 0x18a   : > { %1206 = vrsqrt.f32 %v417_v43 }
 0x193   : > { %v1203_v44 = vpop.eup %1202 }
 0x194   : > { %v427_v45 = vmul.f32 %v1203_v44, %v1201_v31  ;;  %v1205_v46 = vpop.eup %1204 }
 0x196   : > { %v430_v47 = vmul.f32 %v1205_v46, %v427_v45 }
 0x197   : > { %v1207_v48 = vpop.eup %1206 }
 0x198   : > { %v428_v49 = vmul.f32 %v1207_v48, %v1199_v30  ;;  %v439_v50 = vsub.f32 1.0, %v430_v47  ;;  %v441_v51 = vsub.f32 0.0, %v430_v47 }
 0x19a   : > { %v431_v52 = vmul.f32 %v1205_v46, %v428_v49  ;;  %v443_v53 = vsel %vm437_vm2, %v439_v50, %v441_v51  ;;  %v881_v50 = vld [vmem:[%s1526_s3 + $0x8] sm:$0xf] }
 0x19b   : > { %v886_v51 = vsel %vm497_vm5, %v881_v50, 0 }
 0x19c   : > { %v440_v54 = vsub.f32 1.0, %v431_v52  ;;  %v442_v55 = vsub.f32 0.0, %v431_v52 }
 0x19e   : > { %v444_v56 = vsel %vm438_vm3, %v440_v54, %v442_v55 }
 0x19f   : > { %v1401_v57 = vpack.c.bf16 %v444_v56, %v443_v53 }
 0x1a1   : > { %1097 = vmatmul.mubr.msk.bf16.vlgmr.msra.gmra.mxu0 %vm411_vm4, %v1401_v57 }
 0x1a2   : > { %1108 = vmatprep.mubr.msk.bf16.mxu0 %vm1271_vm0, %v1270_v0  ;;  %1107 = vmatpush3.bf16.msra.mxu0 %v546_v61 }
 0x1a3   : > { %1118 = vmatprep.subr.bf16.mxu0 %v1270_v0 }
 0x1a9   : > { %1109 = vmatmul.mubr.msk.bf16.vlgmr.msra.gmra.mxu0 %vm228_vm1, %v446_v35 }
 0x1aa   : > { %1120 = vmatprep.mubr.msk.bf16.mxu0 %vm1271_vm0, %v1270_v0  ;;  %1119 = vmatpush3.bf16.msra.mxu0 %v640_v11 }
 0x1ab   : > { %1130 = vmatprep.subr.bf16.mxu0 %v1270_v0 }
 0x261   : > { %v485_v62 = vpop.f32.mrf.mxu0 }
 0x263   : > { %v1098_v63 = vpop.f32.mrf.mxu0 }
 0x265   : > { %v488_v3 = vpop.f32.mrf.mxu0 }
 0x266   : > { %v492_v4 = vpack.c.bf16 %v488_v3, %v485_v62 }
 0x267   : > { %v1099_v5 = vpop.f32.mrf.mxu0 }
 0x268   : > { %1103 = vmatmul.mubr.msk.bf16.vlgmr.msra.gmra.mxu1 %vm228_vm1, %v492_v4  ;;  %v1045_v5 = vld [vmem:[%s1527_s4] ss:$0 sm:$0xff] }
 0x269   : > { %1113 = vmatpush3.bf16.msra.mxu1 %v492_v4  ;;  %1114 = vmatprep.mubr.msk.bf16.mxu1 %vm1271_vm0, %v1270_v0  ;;  %v582_v6 = vpop.f32.mrf.mxu0 }
 0x26a   : > { %1124 = vmatprep.subr.bf16.mxu1 %v1270_v0 }
 0x26b   : > { %v1110_v7 = vpop.f32.mrf.mxu0 }
 0x26d   : > { %v585_v8 = vpop.f32.mrf.mxu0 }
 0x26f   : > { %v1111_v9 = vpop.f32.mrf.mxu0 }
 0x270   : > { %1115 = vmatmul.mubr.msk.bf16.vlgmr.msra.gmra.mxu1 %vm411_vm4, %v1401_v57 }
 0x271   : > { %1126 = vmatprep.mubr.msk.bf16.mxu1 %vm1271_vm0, %v1270_v0 }
 0x328   : > { %v535_v12 = vpop.f32.mrf.mxu1 }
 0x329   : > { %v583_v25 = vadd.f32 %v582_v6, %v535_v12 }
 0x32a   : > { %v1104_v13 = vpop.f32.mrf.mxu1 }
 0x32c   : > { %v538_v14 = vpop.f32.mrf.mxu1 }
 0x32d   : > { %v586_v30 = vadd.f32 %v585_v8, %v538_v14 }
 0x32e   : > { %v1105_v15 = vpop.f32.mrf.mxu1 }
 0x330   : > { %v623_v16 = vpop.f32.mrf.mxu1 }
 0x331   : > { %v630_v18 = vmul.f32 2.0, %v623_v16 }
 0x332   : > { %v1116_v17 = vpop.f32.mrf.mxu1 }
 0x333   : > { %v632_v22 = vsub.f32 %v630_v18, %v1364_v2 }
 0x334   : > { %v626_v19 = vpop.f32.mrf.mxu1 }
 0x335   : > { %v631_v20 = vmul.f32 2.0, %v626_v19 }
 0x336   : > { %v1117_v21 = vpop.f32.mrf.mxu1 }
 0x337   : > { %v633_v23 = vsub.f32 %v631_v20, %v1362_v1 }
 0x339   : > { %v634_v24 = vpack.c.bf16 %v633_v23, %v632_v22 }
 0x33b   : > { %1121 = vmatmul.mubr.msk.bf16.vlgmr.msra.gmra.mxu0 %vm228_vm1, %v634_v24 }
 0x33c   : > { %1132 = vmatprep.mubr.msk.bf16.mxu0 %vm1271_vm0, %v1270_v0  ;;  %1131 = vmatpush3.bf16.msra.mxu0 %v745_v40 }
 0x33d   : > { %1142 = vmatprep.subr.bf16.mxu0 %v1270_v0 }
 0x3fb   : > { %v676_v26 = vpop.f32.mrf.mxu0 }
 0x3fc   : > { %v683_v27 = vadd.f32 %v676_v26, %v583_v25 }
 0x3fd   : > { %v1122_v29 = vpop.f32.mrf.mxu0 }
 0x3fe   : > { %v692_v32 = vadd.f32 %v1039_v28, %v683_v27 }
 0x3ff   : > { %v679_v31 = vpop.f32.mrf.mxu0 }
 0x400   : > { %v684_v2 = vadd.f32 %v679_v31, %v586_v30  ;;  %v694_v34 = vmax.f32 %v692_v32, 0.0 }
 0x401   : > { %v1123_v33 = vpop.f32.mrf.mxu0 }
 0x402   : > { %v693_v1 = vadd.f32 %v1039_v28, %v684_v2 }
 0x404   : > { %v695_v35 = vmax.f32 %v693_v1, 0.0 }
 0x406   : > { %v696_v36 = vpack.c.bf16 %v695_v35, %v694_v34 }
 0x408   : > { %1125 = vmatpush3.bf16.msra.mxu1 %v696_v36 }
 0x409   : > { %1136 = vmatprep.subr.bf16.mxu1 %v1270_v0 }
 0x40b   : > { %1127 = vmatmul.mubr.msk.bf16.vlgmr.msra.gmra.mxu1 %vm411_vm4, %v1401_v57 }
 0x40c   : > { %1137 = vmatpush3.bf16.msra.mxu1 %v792_v38  ;;  %1138 = vmatprep.mubr.msk.bf16.mxu1 %vm1271_vm0, %v1270_v0 }
 0x40d   : > { %1148 = vmatprep.subr.bf16.mxu1 %v1270_v0 }
 0x413   : > { %1139 = vmatmul.mubr.msk.bf16.vlgmr.msra.gmra.mxu1 %vm228_vm1, %v696_v36 }
 0x414   : > { %1150 = vmatprep.mubr.msk.bf16.mxu1 %vm1271_vm0, %v1270_v0  ;;  %1149 = vmatpush3.bf16.msra.mxu1 %v886_v51 }
 0x4cb   : > { %v732_v41 = vpop.f32.mrf.mxu1 }
 0x4cd   : > { %v1128_v42 = vpop.f32.mrf.mxu1 }
 0x4cf   : > { %v735_v43 = vpop.f32.mrf.mxu1 }
 0x4d0   : > { %v739_v44 = vpack.c.bf16 %v735_v43, %v732_v41 }
 0x4d1   : > { %v1129_v45 = vpop.f32.mrf.mxu1 }
 0x4d2   : > { %1133 = vmatmul.mubr.msk.bf16.vlgmr.msra.gmra.mxu0 %vm228_vm1, %v739_v44 }
 0x4d3   : > { %1143 = vmatpush3.bf16.msra.mxu0 %v739_v44  ;;  %v828_v46 = vpop.f32.mrf.mxu1  ;;  %1144 = vmatprep.mubr.msk.bf16.mxu0 %vm1271_vm0, %v1270_v0 }
 0x4d5   : > { %v1140_v47 = vpop.f32.mrf.mxu1 }
 0x4d7   : > { %v831_v48 = vpop.f32.mrf.mxu1 }
 0x4d9   : > { %v1141_v49 = vpop.f32.mrf.mxu1 }
 0x4da   : > { %1145 = vmatmul.mubr.msk.bf16.vlgmr.msra.gmra.mxu0 %vm411_vm4, %v1401_v57 }
 0x592   : > { %v781_v52 = vpop.f32.mrf.mxu0 }
 0x593   : > { %v829_v3 = vadd.f32 %v828_v46, %v781_v52 }
 0x594   : > { %v1134_v53 = vpop.f32.mrf.mxu0 }
 0x596   : > { %v784_v54 = vpop.f32.mrf.mxu0 }
 0x597   : > { %v832_v8 = vadd.f32 %v831_v48, %v784_v54 }
 0x598   : > { %v1135_v55 = vpop.f32.mrf.mxu0 }
 0x59a   : > { %v869_v56 = vpop.f32.mrf.mxu0 }
 0x59b   : > { %v876_v58 = vmul.f32 2.0, %v869_v56 }
 0x59c   : > { %v1146_v0 = vpop.f32.mrf.mxu0 }
 0x59d   : > { %v878_v62 = vsub.f32 %v876_v58, %v694_v34 }
 0x59e   : > { %v872_v59 = vpop.f32.mrf.mxu0 }
 0x59f   : > { %v877_v60 = vmul.f32 2.0, %v872_v59 }
 0x5a0   : > { %v1147_v61 = vpop.f32.mrf.mxu0 }
 0x5a1   : > { %v879_v57 = vsub.f32 %v877_v60, %v695_v35 }
 0x5a3   : > { %v880_v63 = vpack.c.bf16 %v879_v57, %v878_v62 }
 0x5a5   : > { %1151 = vmatmul.mubr.msk.bf16.vlgmr.msra.gmra.mxu1 %vm228_vm1, %v880_v63 }
 0x665   : > { %v922_v4 = vpop.f32.mrf.mxu1 }
 0x666   : > { %v929_v6 = vadd.f32 %v922_v4, %v829_v3 }
 0x667   : > { %v1152_v7 = vpop.f32.mrf.mxu1 }
 0x668   : > { %v938_v9 = vadd.f32 %v1045_v5, %v929_v6 }
 0x669   : > { %v925_v10 = vpop.f32.mrf.mxu1 }
 0x66a   : > { %v940_v11 = vmax.f32 %v938_v9, 0.0  ;;  %v930_v12 = vadd.f32 %v925_v10, %v832_v8 }
 0x66b   : > { %v1153_v13 = vpop.f32.mrf.mxu1 }
 0x66c   : > { %942 = vst.msk [vmem:[%s217_s13] sm:$0xff] %vm411_vm4, %v940_v11  ;;  %v939_v14 = vadd.f32 %v1045_v5, %v930_v12 }
 0x66e   : > { %v941_v15 = vmax.f32 %v939_v14, 0.0 }
 0x670   : > { %943 = vst.msk [vmem:[%s217_s13 + $0x8] sm:$0xff] %vm411_vm4, %v941_v15 }
 0x671   : > { %1221 = shalt.err (!%p1218_p3)
}
 0x672   : > { %s1222_s6 = scalar_lea.hbm %s1478_s17, 256  ;;  %s1226_s9 = scalar_lea.hbm %s1528_s5, 512 }
 0x673   : > { %p1223_p4 = scmp.ne.s32.totalorder %s1478_s17, %s1222_s6  ;;  %p1227_p9 = scmp.lt.s32.totalorder %s1478_s17, %s1528_s5 }
 0x674   : > { %p1228_p10 = scmp.lt.s32.totalorder %s1226_s9, %s1222_s6 }
 0x675   : > { %p1224_p7 = pnand %p1223_p4, %p1344_p5 }
 0x676   : > { %p1229_p11 = por %p1228_p10, %p1227_p9 }
 0x677   : > { %p1225_p8 = pneg %p1224_p7 }
 0x679   : > { %p1230_p12 = pnand %p1229_p11, %p1225_p8 }
 0x67b   : > { %1233 = shalt.err (!%p1230_p12)
}
 0x67c   : > { %s1274_s12 = smov 128   ;;  %s1275_s13 = smov 8  }
 0x67d   : > { %1154 = dma.vmem_to_hbm [thread:$0]  (%p1344_p5), %s1480_s14, 256, %s1478_s17, %s1483_s22, %s1274_s12, %s1274_s12, %s1275_s13  }
 0x67e PF: > { %p1160_p13 = scmp.ge.s32.totalorder %s1268_s21, 2  ;;  %s973_s15 = sand.u32 1, %s1256_s18  }
 0x67f   : > { %s974_s16 = scalar_lea.sflag [#allocation3], %s973_s15 }
 0x680   : > { %p1157_p0 = pnand %p1160_p13, %p1348_p6 }
 0x682   : > { %p1158_p1 = pneg %p1157_p0 }
 0x684   : > { %1251 = dma.done.wait (%p1158_p1), %s974_s16, 256  }
 0x685   : > { %1253 = vsyncadd (%p1158_p1), %s974_s16, 4294967040  ;;  %p15_p2 = scmp.ge.s32.totalorder %s1331_s24, 4   ;;  %s1531_s18 = smov %s1260_s19 }
 0x686   : > { %s1532_s19 = smov %s1264_s20  ;;  %s1533_s20 = smov %s1342_s27 }
 0x687   : > { %s1534_s21 = smov %s1331_s24  ;;  %17 = sbr.rel (!%p15_p2) target bundleno = 3 (0x3), region = 75 }
 0x68c   :  { %979 = vsyncpa [#allocation3], 1 }
 0x68d   :  { %981 = vsyncpa [#allocation3 + $0x1], 1 }

// kernel: tpu_custom_call.1
= control target key start
LH: loop header
LB: loop body
LE: loop exit
PB: predicated region body
PF: predicated region fallthrough
CT: control target
= control target key end

     0   :  { %10 = vsyncpa [#allocation3], 0  ;;  %s1523_s0 = inlined_call_operand.vmem [shape: f32[2,16,8], index: 0, kind: input, shape index: {}]   ;;  %s1524_s1 = inlined_call_operand.vmem [shape: bf16[24,8], index: 1, kind: input, shape index: {}]   ;;  %s1525_s2 = inlined_call_operand.vmem [shape: f32[1,8], index: 2, kind: input, shape index: {}]   ;;  %s1526_s3 = inlined_call_operand.vmem [shape: bf16[24,16], index: 3, kind: input, shape index: {}]   ;;  %s1527_s4 = inlined_call_operand.vmem [shape: f32[1,16], index: 4, kind: input, shape index: {}]   ;;  %s1528_s5 = inlined_call_operand.hbm [shape: f32[2,16,16], index: 5, kind: output, shape index: {}]  }
   0x1   :  { %12 = vsyncpa [#allocation3 + $0x1], 0  ;;  %s1306_s18 = smov 0   ;;  %s1308_s19 = smov 0  }
   0x2   :  { %s1310_s20 = smov 0   ;;  %s1312_s21 = smov 0  }
   0x3 LB: > { %s1327_s22 = sadd.s32 4294967295, %s1268_s21   ;;  %s1020_s23 = sadd.s32 4294967294, %s1268_s21   ;;  %s1268_s21 = sphi %s1312_s21, %s1534_s21   ;;  %s1264_s20 = sphi %s1310_s20, %s1533_s20   ;;  %s1260_s19 = sphi %s1308_s19, %s1532_s19   ;;  %s1256_s18 = sphi %s1306_s18, %s1531_s18  }
   0x4   : > { %s1331_s24 = sadd.s32 1, %s1268_s21   ;;  %s135_s25 = sadd.s32 1, %s1264_s20 }
   0x5   : > { %s132_s26 = ssub.s32 %s1268_s21, %s1331_s24  ;;  %p145_p0 = scmp.ne.s32.totalorder %s1264_s20, %s1260_s19 }
   0x6   : > { %p133_p1 = scmp.eq.s32.totalorder %s132_s26, 0  ;;  %p146_p2 = scmp.eq.s32.totalorder %s1327_s22, 1 }
   0x7   : > { %p151_p3 = scmp.ne.s32.totalorder %s1260_s19, %s1256_s18  ;;  %p152_p4 = scmp.eq.s32.totalorder %s1020_s23, 1 }
   0x8   : > { %s1342_s27 = scalar_select %p133_p1, %s1264_s20, %s135_s25  }
   0x9   : > { %p1344_p5 = por %p146_p2, %p145_p0  ;;  %p1348_p6 = por %p152_p4, %p151_p3 }
   0xa   : > { %p1023_p7 = scmp.ge.s32.totalorder %s1268_s21, 1  ;;  %p190_p8 = scmp.lt.s32.totalorder %s1268_s21, 3 }
   0xc   : > { %p191_p9 = pnand %p1023_p7, %p190_p8 }
   0xd   : > { %p218_p10 = scmp.lt.s32.totalorder (!%p191_p9), %s1327_s22, 1  ;;  %s215_s8 = sand.u32 (!%p191_p9), 1, %s1260_s19  }
   0xe   : > { %194 = sbr.rel (%p191_p9) target bundleno = 1662 (0x67e), region = 40  ;;  %s1024_s11 = sshll.u32 (!%p191_p9), %s215_s8, 4 }
   0xf   : > { %s1052_s12 = sshll.u32 (!%p191_p9), %s1327_s22, 8  ;;  %s217_s13 = scalar_lea.vmem (!%p191_p9), [#allocation2], %s1024_s11 }
  0x10   : > { %s958_s14 = sshll.u32 (!%p191_p9), %s217_s13, 4  ;;  %s1478_s17 = scalar_lea.hbm (!%p191_p9), %s1528_s5, %s1052_s12  ;;  %s1480_s14 = int_to_ptr.vmem [resolvable:$true] %s958_s14 }
  0x11   : > { %s1208_s23 = scalar_lea.vmem (!%p191_p9), %s1480_s14, 256  ;;  %s1273_s25 = smov (!%p191_p9), [#allocation2]  }
  0x12   : > { %p1209_p11 = scmp.ne.s32.totalorder (!%p191_p9), %s1480_s14, %s1208_s23  ;;  %s1212_s26 = sshll.u32 (!%p191_p9), %s1273_s25, 4  ;;  %s1213_s26 = int_to_ptr.vmem [resolvable:$false] %s1212_s26 }
  0x13   : > { %v1270_v0 = vmov 0.0   ;;  %vm1271_vm0 = vmmov 0   ;;  %s219_s30 = scalar_select %p218_p10, %s1327_s22, 1  ;;  %vm228_vm1 = vcmask 64512   ;;  %v1272_v7 = vmov 1.0  }
  0x14   : > { %1087 = vmatprep.subr.mxu1 %v1270_v0  ;;  %1091 = vmatprep.mubr.msk.f32.mxu1 %vm1271_vm0, %v1270_v0  ;;  %v399_v8 = vlaneseq  ;;  %vm411_vm4 = vcmask 130048   ;;  %v493_v58 = vld [vmem:[%s1524_s1 + $0x4] sm:$0xf]  ;;  %vm497_vm5 = vcmask 1043456   ;;  %v447_v60 = vld [vmem:[%s1524_s1] sm:$0xf]  ;;  %p1210_p12 = pnand %p1209_p11, %p1344_p5  ;;  %p1215_p0 = scmp.lt.s32.totalorder %s1480_s14, %s1213_s26 }
  0x15   : > { %s1051_s6 = sshll.u32 %s219_s30, 4  ;;  %v499_v59 = vsel %vm497_vm5, %v493_v58, 0  ;;  %v546_v61 = vsel %vm497_vm5, %v447_v60, 0  ;;  %s1483_s22 = scalar_lea.sflag [#allocation3], %s215_s8 }
  0x16   : > { %s222_s9 = scalar_lea.vmem %s1523_s0, %s1051_s6  ;;  %v400_v9 = vshrl.u32 %v399_v8, 7  ;;  %v436_v11 = vand.u32 127, %v399_v8  ;;  %p1211_p13 = pneg %p1210_p12 }
  0x17   : > { %v1362_v1 = vld [vmem:[%s222_s9 + $0x8] sm:$0xff]  ;;  %v1364_v2 = vld [vmem:[%s222_s9] sm:$0xff]  ;;  %s1214_s30 = scalar_lea.vmem %s1213_s26, 512 }
  0x18   : > { %1080 = vmatprep.subr.msk.mxu0 %vm228_vm1, %v1362_v1  ;;  %v227_v3 = vmul.f32 %v1362_v1, %v1362_v1  ;;  %1084 = vmatprep.mubr.msk.f32.mxu0 %vm228_vm1, %v1364_v2  ;;  %v226_v4 = vmul.f32 %v1364_v2, %v1364_v2  ;;  %v434_v10 = vadd.s32 8, %v400_v9  ;;  %vm437_vm2 = vcmp.eq.s32.totalorder %v400_v9, %v436_v11  ;;  %p1216_p1 = scmp.lt.s32.totalorder %s1214_s30, %s1208_s23 }
  0x19   : > { %1081 = vmatpush3.xpose.msk.msra.mxu0 %vm228_vm1, %v1362_v1  ;;  %v401_v13 = vsub.s32 0, %v400_v9  ;;  %v446_v35 = vpack.c.bf16 %v1362_v1, %v1364_v2 }
  0x1a   : > { %1088 = vmatpush3.xpose.msk.msra.mxu1 %vm228_vm1, %v227_v3  ;;  %1082 = vmatprep.subr.msk.mxu0 %vm228_vm1, %v1364_v2  ;;  %v310_v5 = vsel %vm228_vm1, %v226_v4, 0.0  ;;  %v313_v6 = vsel %vm228_vm1, %v227_v3, 0.0  ;;  %vm438_vm3 = vcmp.eq.s32.totalorder %v434_v10, %v436_v11  ;;  %v635_v10 = vld [vmem:[%s1524_s1 + $0x8] sm:$0xf]  ;;  %p1217_p2 = por %p1216_p1, %p1215_p0 }
  0x1b   : > { %1089 = vmatprep.subr.mxu1 %v1270_v0  ;;  %311 = vadd.xlane.f32.xlu0 %v310_v5  ;;  %v640_v11 = vsel %vm497_vm5, %v635_v10, 0 }
  0x1c   : > { %p1218_p3 = pnand %p1217_p2, %p1211_p13 }
  0x1d   : > { %1083 = vmatpush3.xpose.msk.msra.mxu0 %vm228_vm1, %v1364_v2 }
  0x1e   : > { %1090 = vmatpush3.xpose.msk.msra.mxu1 %vm228_vm1, %v226_v4  ;;  %1094 = vmatprep.subr.bf16.mxu0 %v1270_v0 }
  0x1f   : > { %314 = vadd.xlane.f32.xlu0 %v313_v6  ;;  %1100 = vmatprep.subr.bf16.mxu1 %v1270_v0 }
  0x20   : > { %1085 = vmatmul.mubr.msk.f32.vlgmr.msra.gmra.mxu0 %vm228_vm1, %v1362_v1 }
  0x21   : > { %1092 = vmatmul.mubr.msk.f32.vlgmr.msra.gmra.mxu1 %vm228_vm1, %v1272_v7  ;;  %1096 = vmatprep.mubr.msk.bf16.mxu0 %vm1271_vm0, %v1270_v0 }
  0x22   : > { %1102 = vmatprep.mubr.msk.bf16.mxu1 %vm1271_vm0, %v1270_v0  ;;  %1095 = vmatpush3.bf16.msra.mxu0 %v446_v35 }
  0x23   : > { %1106 = vmatprep.subr.bf16.mxu0 %v1270_v0  ;;  %1101 = vmatpush3.bf16.msra.mxu1 %v499_v59 }
  0x24   : > { %1112 = vmatprep.subr.bf16.mxu1 %v1270_v0 }
  0xa4   : > { %v312_v12 = vpop.xlane.xlu0 %311 }
  0xa8   : > { %v315_v15 = vpop.xlane.xlu0 %314 }
  0xe0   : > { %v1086_v14 = vpop.f32.mrf.mxu0 }
  0xe1   : > { %v396_v16 = vmul.f32 2.0, %v1086_v14  ;;  %v391_v17 = vpop.f32.mrf.mxu1 }
  0xe2   : > { %v301_v18 = vpop.f32.mrf.mxu0  ;;  %v402_v19 = vrot.slane %v391_v17, %v401_v13 }
  0xe3   : > { %v395_v20 = vmul.f32 2.0, %v301_v18  ;;  %v398_v21 = vsub.f32 %v315_v15, %v396_v16  ;;  %v1093_v22 = vpop.f32.mrf.mxu1 }
  0xe5   : > { %v397_v23 = vsub.f32 %v312_v12, %v395_v20  ;;  %v404_v24 = vadd.f32 %v402_v19, %v398_v21 }
  0xe7   : > { %v403_v25 = vadd.f32 %v402_v19, %v397_v23  ;;  %v406_v26 = vsub.f32 0.0, %v404_v24 }
  0xe9   : > { %v405_v27 = vsub.f32 0.0, %v403_v25  ;;  %v409_v28 = vmul.f32 1.442695, %v406_v26 }
  0xeb   : > { %v407_v29 = vmul.f32 1.442695, %v405_v27  ;;  %1198 = vpow2.f32 %v409_v28  ;;  %v1039_v28 = vld [vmem:[%s1525_s2] ss:$0 sm:$0xff] }
  0xed   : > { %1200 = vpow2.f32 %v407_v29 }
  0xf8   : > { %v1199_v30 = vpop.eup %1198 }
  0xf9   : > { %v415_v33 = vsel %vm411_vm4, %v1199_v30, 0.0 }
  0xfa   : > { %v1201_v31 = vpop.eup %1200 }
  0xfb   : > { %v412_v32 = vsel %vm411_vm4, %v1201_v31, 0.0 }
  0xfc   : > { %413 = vadd.xlane.f32.xlu1 %v412_v32  ;;  %v418_v34 = vadd.f32 %v415_v33, %v412_v32 }
  0xfe   : > { %v419_v36 = vrot.slane %v418_v34, 4 }
 0x100   : > { %416 = vadd.xlane.f32.xlu1 %v415_v33  ;;  %v420_v37 = vadd.f32 %v419_v36, %v418_v34 }
 0x102   : > { %v421_v38 = vrot.slane %v420_v37, 2 }
 0x104   : > { %v422_v39 = vadd.f32 %v421_v38, %v420_v37  ;;  %v697_v37 = vld [vmem:[%s1526_s3] sm:$0xf] }
 0x105   : > { %v792_v38 = vsel %vm497_vm5, %v697_v37, 0 }
 0x106   : > { %v423_v40 = vrot.slane %v422_v39, 1 }
 0x108   : > { %v424_v41 = vadd.f32 %v423_v40, %v422_v39  ;;  %v740_v39 = vld [vmem:[%s1526_s3 + $0x4] sm:$0xf] }
 0x109   : > { %v745_v40 = vsel %vm497_vm5, %v740_v39, 0 }
 0x185   : > { %v414_v42 = vpop.xlane.xlu1 %413 }
 0x186   : > { %1202 = vrsqrt.f32 %v414_v42 }
 0x187   : > { %1204 = vrsqrt.f32 %v424_v41 }
 0x189   : > { %v417_v43 = vpop.xlane.xlu1 %416 }
 0x18a   : > { %1206 = vrsqrt.f32 %v417_v43 }
 0x193   : > { %v1203_v44 = vpop.eup %1202 }
 0x194   : > { %v427_v45 = vmul.f32 %v1203_v44, %v1201_v31  ;;  %v1205_v46 = vpop.eup %1204 }
 0x196   : > { %v430_v47 = vmul.f32 %v1205_v46, %v427_v45 }
 0x197   : > { %v1207_v48 = vpop.eup %1206 }
 0x198   : > { %v428_v49 = vmul.f32 %v1207_v48, %v1199_v30  ;;  %v439_v50 = vsub.f32 1.0, %v430_v47  ;;  %v441_v51 = vsub.f32 0.0, %v430_v47 }
 0x19a   : > { %v431_v52 = vmul.f32 %v1205_v46, %v428_v49  ;;  %v443_v53 = vsel %vm437_vm2, %v439_v50, %v441_v51  ;;  %v881_v50 = vld [vmem:[%s1526_s3 + $0x8] sm:$0xf] }
 0x19b   : > { %v886_v51 = vsel %vm497_vm5, %v881_v50, 0 }
 0x19c   : > { %v440_v54 = vsub.f32 1.0, %v431_v52  ;;  %v442_v55 = vsub.f32 0.0, %v431_v52 }
 0x19e   : > { %v444_v56 = vsel %vm438_vm3, %v440_v54, %v442_v55 }
 0x19f   : > { %v1401_v57 = vpack.c.bf16 %v444_v56, %v443_v53 }
 0x1a1   : > { %1097 = vmatmul.mubr.msk.bf16.vlgmr.msra.gmra.mxu0 %vm411_vm4, %v1401_v57 }
 0x1a2   : > { %1108 = vmatprep.mubr.msk.bf16.mxu0 %vm1271_vm0, %v1270_v0  ;;  %1107 = vmatpush3.bf16.msra.mxu0 %v546_v61 }
 0x1a3   : > { %1118 = vmatprep.subr.bf16.mxu0 %v1270_v0 }
 0x1a9   : > { %1109 = vmatmul.mubr.msk.bf16.vlgmr.msra.gmra.mxu0 %vm228_vm1, %v446_v35 }
 0x1aa   : > { %1120 = vmatprep.mubr.msk.bf16.mxu0 %vm1271_vm0, %v1270_v0  ;;  %1119 = vmatpush3.bf16.msra.mxu0 %v640_v11 }
 0x1ab   : > { %1130 = vmatprep.subr.bf16.mxu0 %v1270_v0 }
 0x261   : > { %v485_v62 = vpop.f32.mrf.mxu0 }
 0x263   : > { %v1098_v63 = vpop.f32.mrf.mxu0 }
 0x265   : > { %v488_v3 = vpop.f32.mrf.mxu0 }
 0x266   : > { %v492_v4 = vpack.c.bf16 %v488_v3, %v485_v62 }
 0x267   : > { %v1099_v5 = vpop.f32.mrf.mxu0 }
 0x268   : > { %1103 = vmatmul.mubr.msk.bf16.vlgmr.msra.gmra.mxu1 %vm228_vm1, %v492_v4  ;;  %v1045_v5 = vld [vmem:[%s1527_s4] ss:$0 sm:$0xff] }
 0x269   : > { %1113 = vmatpush3.bf16.msra.mxu1 %v492_v4  ;;  %1114 = vmatprep.mubr.msk.bf16.mxu1 %vm1271_vm0, %v1270_v0  ;;  %v582_v6 = vpop.f32.mrf.mxu0 }
 0x26a   : > { %1124 = vmatprep.subr.bf16.mxu1 %v1270_v0 }
 0x26b   : > { %v1110_v7 = vpop.f32.mrf.mxu0 }
 0x26d   : > { %v585_v8 = vpop.f32.mrf.mxu0 }
 0x26f   : > { %v1111_v9 = vpop.f32.mrf.mxu0 }
 0x270   : > { %1115 = vmatmul.mubr.msk.bf16.vlgmr.msra.gmra.mxu1 %vm411_vm4, %v1401_v57 }
 0x271   : > { %1126 = vmatprep.mubr.msk.bf16.mxu1 %vm1271_vm0, %v1270_v0 }
 0x328   : > { %v535_v12 = vpop.f32.mrf.mxu1 }
 0x329   : > { %v583_v25 = vadd.f32 %v582_v6, %v535_v12 }
 0x32a   : > { %v1104_v13 = vpop.f32.mrf.mxu1 }
 0x32c   : > { %v538_v14 = vpop.f32.mrf.mxu1 }
 0x32d   : > { %v586_v30 = vadd.f32 %v585_v8, %v538_v14 }
 0x32e   : > { %v1105_v15 = vpop.f32.mrf.mxu1 }
 0x330   : > { %v623_v16 = vpop.f32.mrf.mxu1 }
 0x331   : > { %v630_v18 = vmul.f32 2.0, %v623_v16 }
 0x332   : > { %v1116_v17 = vpop.f32.mrf.mxu1 }
 0x333   : > { %v632_v22 = vsub.f32 %v630_v18, %v1364_v2 }
 0x334   : > { %v626_v19 = vpop.f32.mrf.mxu1 }
 0x335   : > { %v631_v20 = vmul.f32 2.0, %v626_v19 }
 0x336   : > { %v1117_v21 = vpop.f32.mrf.mxu1 }
 0x337   : > { %v633_v23 = vsub.f32 %v631_v20, %v1362_v1 }
 0x339   : > { %v634_v24 = vpack.c.bf16 %v633_v23, %v632_v22 }
 0x33b   : > { %1121 = vmatmul.mubr.msk.bf16.vlgmr.msra.gmra.mxu0 %vm228_vm1, %v634_v24 }
 0x33c   : > { %1132 = vmatprep.mubr.msk.bf16.mxu0 %vm1271_vm0, %v1270_v0  ;;  %1131 = vmatpush3.bf16.msra.mxu0 %v745_v40 }
 0x33d   : > { %1142 = vmatprep.subr.bf16.mxu0 %v1270_v0 }
 0x3fb   : > { %v676_v26 = vpop.f32.mrf.mxu0 }
 0x3fc   : > { %v683_v27 = vadd.f32 %v676_v26, %v583_v25 }
 0x3fd   : > { %v1122_v29 = vpop.f32.mrf.mxu0 }
 0x3fe   : > { %v692_v32 = vadd.f32 %v1039_v28, %v683_v27 }
 0x3ff   : > { %v679_v31 = vpop.f32.mrf.mxu0 }
 0x400   : > { %v684_v2 = vadd.f32 %v679_v31, %v586_v30  ;;  %v694_v34 = vmax.f32 %v692_v32, 0.0 }
 0x401   : > { %v1123_v33 = vpop.f32.mrf.mxu0 }
 0x402   : > { %v693_v1 = vadd.f32 %v1039_v28, %v684_v2 }
 0x404   : > { %v695_v35 = vmax.f32 %v693_v1, 0.0 }
 0x406   : > { %v696_v36 = vpack.c.bf16 %v695_v35, %v694_v34 }
 0x408   : > { %1125 = vmatpush3.bf16.msra.mxu1 %v696_v36 }
 0x409   : > { %1136 = vmatprep.subr.bf16.mxu1 %v1270_v0 }
 0x40b   : > { %1127 = vmatmul.mubr.msk.bf16.vlgmr.msra.gmra.mxu1 %vm411_vm4, %v1401_v57 }
 0x40c   : > { %1137 = vmatpush3.bf16.msra.mxu1 %v792_v38  ;;  %1138 = vmatprep.mubr.msk.bf16.mxu1 %vm1271_vm0, %v1270_v0 }
 0x40d   : > { %1148 = vmatprep.subr.bf16.mxu1 %v1270_v0 }
 0x413   : > { %1139 = vmatmul.mubr.msk.bf16.vlgmr.msra.gmra.mxu1 %vm228_vm1, %v696_v36 }
 0x414   : > { %1150 = vmatprep.mubr.msk.bf16.mxu1 %vm1271_vm0, %v1270_v0  ;;  %1149 = vmatpush3.bf16.msra.mxu1 %v886_v51 }
 0x4cb   : > { %v732_v41 = vpop.f32.mrf.mxu1 }
 0x4cd   : > { %v1128_v42 = vpop.f32.mrf.mxu1 }
 0x4cf   : > { %v735_v43 = vpop.f32.mrf.mxu1 }
 0x4d0   : > { %v739_v44 = vpack.c.bf16 %v735_v43, %v732_v41 }
 0x4d1   : > { %v1129_v45 = vpop.f32.mrf.mxu1 }
 0x4d2   : > { %1133 = vmatmul.mubr.msk.bf16.vlgmr.msra.gmra.mxu0 %vm228_vm1, %v739_v44 }
 0x4d3   : > { %1143 = vmatpush3.bf16.msra.mxu0 %v739_v44  ;;  %v828_v46 = vpop.f32.mrf.mxu1  ;;  %1144 = vmatprep.mubr.msk.bf16.mxu0 %vm1271_vm0, %v1270_v0 }
 0x4d5   : > { %v1140_v47 = vpop.f32.mrf.mxu1 }
 0x4d7   : > { %v831_v48 = vpop.f32.mrf.mxu1 }
 0x4d9   : > { %v1141_v49 = vpop.f32.mrf.mxu1 }
 0x4da   : > { %1145 = vmatmul.mubr.msk.bf16.vlgmr.msra.gmra.mxu0 %vm411_vm4, %v1401_v57 }
 0x592   : > { %v781_v52 = vpop.f32.mrf.mxu0 }
 0x593   : > { %v829_v3 = vadd.f32 %v828_v46, %v781_v52 }
 0x594   : > { %v1134_v53 = vpop.f32.mrf.mxu0 }
 0x596   : > { %v784_v54 = vpop.f32.mrf.mxu0 }
 0x597   : > { %v832_v8 = vadd.f32 %v831_v48, %v784_v54 }
 0x598   : > { %v1135_v55 = vpop.f32.mrf.mxu0 }
 0x59a   : > { %v869_v56 = vpop.f32.mrf.mxu0 }
 0x59b   : > { %v876_v58 = vmul.f32 2.0, %v869_v56 }
 0x59c   : > { %v1146_v0 = vpop.f32.mrf.mxu0 }
 0x59d   : > { %v878_v62 = vsub.f32 %v876_v58, %v694_v34 }
 0x59e   : > { %v872_v59 = vpop.f32.mrf.mxu0 }
 0x59f   : > { %v877_v60 = vmul.f32 2.0, %v872_v59 }
 0x5a0   : > { %v1147_v61 = vpop.f32.mrf.mxu0 }
 0x5a1   : > { %v879_v57 = vsub.f32 %v877_v60, %v695_v35 }
 0x5a3   : > { %v880_v63 = vpack.c.bf16 %v879_v57, %v878_v62 }
 0x5a5   : > { %1151 = vmatmul.mubr.msk.bf16.vlgmr.msra.gmra.mxu1 %vm228_vm1, %v880_v63 }
 0x665   : > { %v922_v4 = vpop.f32.mrf.mxu1 }
 0x666   : > { %v929_v6 = vadd.f32 %v922_v4, %v829_v3 }
 0x667   : > { %v1152_v7 = vpop.f32.mrf.mxu1 }
 0x668   : > { %v938_v9 = vadd.f32 %v1045_v5, %v929_v6 }
 0x669   : > { %v925_v10 = vpop.f32.mrf.mxu1 }
 0x66a   : > { %v940_v11 = vmax.f32 %v938_v9, 0.0  ;;  %v930_v12 = vadd.f32 %v925_v10, %v832_v8 }
 0x66b   : > { %v1153_v13 = vpop.f32.mrf.mxu1 }
 0x66c   : > { %942 = vst.msk [vmem:[%s217_s13] sm:$0xff] %vm411_vm4, %v940_v11  ;;  %v939_v14 = vadd.f32 %v1045_v5, %v930_v12 }
 0x66e   : > { %v941_v15 = vmax.f32 %v939_v14, 0.0 }
 0x670   : > { %943 = vst.msk [vmem:[%s217_s13 + $0x8] sm:$0xff] %vm411_vm4, %v941_v15 }
 0x671   : > { %1221 = shalt.err (!%p1218_p3)
}
 0x672   : > { %s1222_s6 = scalar_lea.hbm %s1478_s17, 256  ;;  %s1226_s9 = scalar_lea.hbm %s1528_s5, 512 }
 0x673   : > { %p1223_p4 = scmp.ne.s32.totalorder %s1478_s17, %s1222_s6  ;;  %p1227_p9 = scmp.lt.s32.totalorder %s1478_s17, %s1528_s5 }
 0x674   : > { %p1228_p10 = scmp.lt.s32.totalorder %s1226_s9, %s1222_s6 }
 0x675   : > { %p1224_p7 = pnand %p1223_p4, %p1344_p5 }
 0x676   : > { %p1229_p11 = por %p1228_p10, %p1227_p9 }
 0x677   : > { %p1225_p8 = pneg %p1224_p7 }
 0x679   : > { %p1230_p12 = pnand %p1229_p11, %p1225_p8 }
 0x67b   : > { %1233 = shalt.err (!%p1230_p12)
}
 0x67c   : > { %s1274_s12 = smov 128   ;;  %s1275_s13 = smov 8  }
 0x67d   : > { %1154 = dma.vmem_to_hbm [thread:$0]  (%p1344_p5), %s1480_s14, 256, %s1478_s17, %s1483_s22, %s1274_s12, %s1274_s12, %s1275_s13  }
 0x67e PF: > { %p1160_p13 = scmp.ge.s32.totalorder %s1268_s21, 2  ;;  %s973_s15 = sand.u32 1, %s1256_s18  }
 0x67f   : > { %s974_s16 = scalar_lea.sflag [#allocation3], %s973_s15 }
 0x680   : > { %p1157_p0 = pnand %p1160_p13, %p1348_p6 }
 0x682   : > { %p1158_p1 = pneg %p1157_p0 }
 0x684   : > { %1251 = dma.done.wait (%p1158_p1), %s974_s16, 256  }
 0x685   : > { %1253 = vsyncadd (%p1158_p1), %s974_s16, 4294967040  ;;  %p15_p2 = scmp.ge.s32.totalorder %s1331_s24, 4   ;;  %s1531_s18 = smov %s1260_s19 }
 0x686   : > { %s1532_s19 = smov %s1264_s20  ;;  %s1533_s20 = smov %s1342_s27 }
 0x687   : > { %s1534_s21 = smov %s1331_s24  ;;  %17 = sbr.rel (!%p15_p2) target bundleno = 3 (0x3), region = 75 }
 0x68c   :  { %979 = vsyncpa [#allocation3], 1 }
 0x68d   :  { %981 = vsyncpa [#allocation3 + $0x1], 1 }

</bundles_post_ra>
